<compile_context>
chip_gen: v7x
topology: tpu7x:2x2x1
jax: 0.10.0
libtpu: 0.0.40
codegen_flags: <defaults>
</compile_context>

<pallas_src>
import functools

import jax
import jax.numpy as jnp
from jax.experimental import pallas as pl
from jax.experimental.pallas import tpu as pltpu


# ----------------------------------------------------------------------------
# Pallas kernel: one grid step = one batch element, whole BAM forward fused.
# ----------------------------------------------------------------------------
def _bam_kernel(x_ref, mask_ref, w1t, b1, w2, b2,
                cw1, cb1, cw2, cb2, cw3, cb3, cw4, cb4,
                o_ref, buf, slab, sa_s,
                *, H, W, Cm, d, Wp, L, M):
    x = x_ref[0].astype(jnp.float32)                     # (C, HW), HW on lanes

    # ---- channel attention: global avg pool + 2x (linear + BN + ReLU) ----
    # Tiny (C x Cm) contractions -> VPU/XLU reductions in f32 (no MXU pushes,
    # no layout transposes).
    pooled = jnp.mean(x, axis=1, keepdims=True)                           # (C, 1)
    h = jnp.maximum(jnp.sum(w1t[...] * pooled, axis=0, keepdims=True)
                    + b1[...], 0.0)                                       # (1, Cm)
    ca = jnp.maximum(jnp.sum(w2[...] * h, axis=1, keepdims=True)
                     + b2[...], 0.0)                                      # (C, 1)

    # ---- spatial attention ----
    # 1x1 conv (+BN+ReLU) == (Cm, C) @ (C, HW) matmul, bf16 MXU operands.
    f1 = jnp.maximum(
        jnp.dot(cw1[...], x.astype(jnp.bfloat16),
                preferred_element_type=jnp.float32) + cb1[...], 0.0)      # (Cm, HW)

    # Zero the flat padded buffer once per step (margins + zero-pad ring),
    # then scatter the H interior rows of f1 into it.
    buf[...] = jnp.zeros(buf.shape, jnp.float32)
    for y in range(H):
        dst = M + (d + y) * Wp + d
        buf[:, dst:dst + W] = f1[:, y * W:(y + 1) * W]

    mask = mask_ref[...]                                                  # (1, L)

    def dilated_conv(wref, bref):
        # im2col: 9 lane-shifted (Cm, L) views of the padded buffer stacked
        # into a (9*Cm, L) slab -> one MXU matmul with K = 9*Cm.
        for ky in range(3):
            for kx in range(3):
                t = ky * 3 + kx
                src = M + ((ky - 1) * Wp + (kx - 1)) * d
                slab[t * Cm:(t + 1) * Cm, :] = buf[:, src:src + L]
        raw = jnp.dot(wref[...], slab[...].astype(jnp.bfloat16),
                      preferred_element_type=jnp.float32)                 # (Cm, L)
        # BN bias + ReLU; the mask re-zeroes the padding ring so it feeds the
        # next dilated conv as true zero padding.
        buf[:, M:M + L] = mask * jnp.maximum(raw + bref[...], 0.0)

    dilated_conv(cw2, cb2)        # dilated 3x3 conv + BN + ReLU  -> f2 in buf
    dilated_conv(cw3, cb3)        # dilated 3x3 conv + BN + ReLU  -> f3 in buf

    # Final 1x1 conv to a single channel (+BN+ReLU): a Cm-row VPU reduce,
    # keeping the MXU free (an (HW,Cm)@(Cm,1) matmul would waste a weight push).
    sa_pad = jnp.maximum(
        jnp.sum(buf[:, M:M + L] * cw4[...], axis=0, keepdims=True)
        + cb4[...], 0.0)                                                  # (1, L)
    # Gather the unpadded interior back to a dense (1, HW) row.
    for y in range(H):
        src = (d + y) * Wp + d
        sa_s[:, y * W:(y + 1) * W] = sa_pad[:, src:src + W]

    # ---- fuse: sigmoid(channel + spatial), residual scale ----
    att = jax.nn.sigmoid(ca + sa_s[...])              # (C,1)+(1,HW) -> (C, HW)
    o_ref[0] = (x + x * att).astype(o_ref.dtype)      # lane-dense store


# ----------------------------------------------------------------------------
# Wrapper
# ----------------------------------------------------------------------------
def bam_pallas(x_nchw, p):
    B, C, H, W = x_nchw.shape
    Cm = p["cw2"].shape[0]
    d = p["dilation"]
    HW = H * W
    Hp, Wp = H + 2 * d, W + 2 * d
    L = Hp * Wp                 # flattened padded image length
    M = d * (Wp + 1)            # margin so every conv tap is an in-range slice
    Lb = L + 2 * M

    # free views (NCHW is contiguous), no data movement
    x_flat = x_nchw.reshape(B, C, HW)

    # interior mask over the flattened padded image (1 inside, 0 on the ring)
    mask = jnp.zeros((Hp, Wp), jnp.float32).at[d:d + H, d:d + W].set(1.0)
    mask = mask.reshape(1, L)

    kern = functools.partial(_bam_kernel, H=H, W=W, Cm=Cm, d=d, Wp=Wp, L=L, M=M)

    names = ["w1t", "b1", "w2", "b2",
             "cw1", "cb1", "cw2", "cb2", "cw3", "cb3", "cw4", "cb4"]
    weights = [mask] + [p[n] for n in names]

    def full_spec(a):
        nd = a.ndim
        return pl.BlockSpec(a.shape, lambda b, _nd=nd: (0,) * _nd)

    # TODO(synk): for large feature maps / v7x's 64 MiB VMEM, add a row-band
    # grid axis with a 2*d-row halo and hoist the channel-attention branch out
    # of the kernel; at these sizes a whole image fits comfortably per step.
    out_flat = pl.pallas_call(
        kern,
        out_shape=jax.ShapeDtypeStruct((B, C, HW), x_flat.dtype),
        grid_spec=pltpu.PrefetchScalarGridSpec(
            num_scalar_prefetch=0,
            grid=(B,),
            in_specs=[pl.BlockSpec((1, C, HW), lambda b: (b, 0, 0))]
                     + [full_spec(a) for a in weights],
            out_specs=pl.BlockSpec((1, C, HW), lambda b: (b, 0, 0)),
            scratch_shapes=[
                pltpu.VMEM((Cm, Lb), jnp.float32),       # padded flat feature buffer
                pltpu.VMEM((9 * Cm, L), jnp.float32),    # im2col slab
                pltpu.VMEM((1, HW), jnp.float32),        # spatial attention map
            ],
        ),
        compiler_params=pltpu.CompilerParams(dimension_semantics=("parallel",)),
    )(x_flat, *weights)
    return out_flat.reshape(B, C, H, W)


# ----------------------------------------------------------------------------
# Deterministic parameter construction (eval-mode BN folded into weight/bias)
# ----------------------------------------------------------------------------
def init_params(key, C, r=16, d=4):
    Cm = max(C // r, 1)
    keys = iter(jax.random.split(key, 32))
    bf16 = jnp.bfloat16

    def affine(n):  # folded BN -> per-channel (scale, shift)
        s = 0.8 + 0.4 * jax.random.uniform(next(keys), (n,), jnp.float32)
        b = 0.1 * jax.random.normal(next(keys), (n,), jnp.float32)
        return s, b

    def w(shape, fan_in):
        return jax.random.normal(next(keys), shape, jnp.float32) / jnp.sqrt(fan_in)

    p = {"dilation": d}

    # channel attention: Linear(C->Cm, no bias)+BN, Linear(Cm->C, no bias)+BN
    rw1 = w((Cm, C), C); s, b = affine(Cm)
    fw1 = rw1 * s[:, None]                       # (Cm, C) folded
    p["w1t"] = fw1.T                             # (C, Cm) f32 (VPU path)
    p["b1"] = b.reshape(1, Cm)
    rw2 = w((C, Cm), Cm); s, b = affine(C)
    fw2 = rw2 * s[:, None]                       # (C, Cm) folded
    p["w2"] = fw2                                # (C, Cm) f32 (VPU path)
    p["b2"] = b.reshape(C, 1)

    # spatial attention: 1x1, dilated 3x3, dilated 3x3, 1x1 (all bias-free + BN)
    rc1 = w((Cm, C, 1, 1), C); s, b = affine(Cm)
    e1 = rc1 * s[:, None, None, None]
    p["ref_cw1"] = e1
    p["cw1"] = e1[:, :, 0, 0].astype(bf16)       # (Cm, C) bf16 MXU weight
    p["cb1"] = b.reshape(Cm, 1)

    rc2 = w((Cm, Cm, 3, 3), Cm * 9); s, b = affine(Cm)
    e2 = rc2 * s[:, None, None, None]
    p["ref_cw2"] = e2
    # im2col weight: [co, (ky*3+kx)*Cm + ci]
    p["cw2"] = jnp.transpose(e2, (0, 2, 3, 1)).reshape(Cm, 9 * Cm).astype(bf16)
    p["cb2"] = b.reshape(Cm, 1)

    rc3 = w((Cm, Cm, 3, 3), Cm * 9); s, b = affine(Cm)
    e3 = rc3 * s[:, None, None, None]
    p["ref_cw3"] = e3
    p["cw3"] = jnp.transpose(e3, (0, 2, 3, 1)).reshape(Cm, 9 * Cm).astype(bf16)
    p["cb3"] = b.reshape(Cm, 1)

    rc4 = w((1, Cm, 1, 1), Cm); s, b = affine(1)
    e4 = rc4 * s[:, None, None, None]
    p["ref_cw4"] = e4
    p["cw4"] = e4[0, :, 0, 0].reshape(Cm, 1)     # f32 (VPU reduce path)
    p["cb4"] = b.reshape(1, 1)
    return p


# ----------------------------------------------------------------------------
# Pure-JAX reference (independent path: lax.conv_general_dilated), using the
# same bf16 MXU-operand rounding as the kernel so tolerances stay tight.
# ----------------------------------------------------------------------------
def bam_reference(x, p):
    d = p["dilation"]
    bf16 = jnp.bfloat16
    B, C, H, W = x.shape

    # channel attention (f32, like the kernel)
    pooled = x.mean(axis=(2, 3))                                    # (B, C)
    h = jax.nn.relu(pooled @ p["w1t"] + p["b1"])                    # (B, Cm)
    ca = jax.nn.relu(h @ p["w2"].T + p["b2"].reshape(1, C))         # (B, C)
    ca = ca[:, :, None, None]

    def conv(f, w_oihw, bias, dil, pad, cast_bf16=True):
        lhs = f.astype(bf16) if cast_bf16 else f
        rhs = w_oihw.astype(bf16) if cast_bf16 else w_oihw
        o = jax.lax.conv_general_dilated(
            lhs, rhs, window_strides=(1, 1),
            padding=[(pad, pad), (pad, pad)], rhs_dilation=(dil, dil),
            dimension_numbers=("NCHW", "OIHW", "NCHW"),
            preferred_element_type=jnp.float32)
        return jax.nn.relu(o + bias.reshape(1, -1, 1, 1))

    f = conv(x, p["ref_cw1"], p["cb1"], 1, 0)
    f = conv(f, p["ref_cw2"], p["cb2"], d, d)
    f = conv(f, p["ref_cw3"], p["cb3"], d, d)
    sa = conv(f, p["ref_cw4"], p["cb4"], 1, 0, cast_bf16=False)     # (B, 1, H, W)

    att = jax.nn.sigmoid(ca + sa)
    return x + x * att


if __name__ == "__main__":
    B, C, H, W = 2, 32, 16, 16
    r, d = 16, 4

    key = jax.random.PRNGKey(0)
    kx, kp = jax.random.split(key)
    x = jax.random.normal(kx, (B, C, H, W), jnp.float32)            # NCHW, like PyTorch
    params = init_params(kp, C, r=r, d=d)

    out = jax.block_until_ready(bam_pallas(x, params))
    ref = jax.block_until_ready(bam_reference(x, params))

    assert out.shape == (B, C, H, W)
    err = float(jnp.max(jnp.abs(out - ref)))
    assert jnp.allclose(out, ref, rtol=5e-3, atol=5e-3), err

    print("KERNEL_OK")
</pallas_src>

<mosaic_0001>
module attributes {stable_mosaic.version = 11 : i64} {
  func.func @_bam_kernel(%arg0: i32, %arg1: memref<1x32x256xf32, #tpu.memory_space<vmem>>, %arg2: memref<1x576xf32, #tpu.memory_space<vmem>>, %arg3: memref<32x2xf32, #tpu.memory_space<vmem>>, %arg4: memref<1x2xf32, #tpu.memory_space<vmem>>, %arg5: memref<32x2xf32, #tpu.memory_space<vmem>>, %arg6: memref<32x1xf32, #tpu.memory_space<vmem>>, %arg7: memref<2x32xbf16, #tpu.memory_space<vmem>>, %arg8: memref<2x1xf32, #tpu.memory_space<vmem>>, %arg9: memref<2x18xbf16, #tpu.memory_space<vmem>>, %arg10: memref<2x1xf32, #tpu.memory_space<vmem>>, %arg11: memref<2x18xbf16, #tpu.memory_space<vmem>>, %arg12: memref<2x1xf32, #tpu.memory_space<vmem>>, %arg13: memref<2x1xf32, #tpu.memory_space<vmem>>, %arg14: memref<1x1xf32, #tpu.memory_space<vmem>>, %arg15: memref<1x32x256xf32, #tpu.memory_space<vmem>>, %arg16: memref<2x776xf32, #tpu.memory_space<vmem>>, %arg17: memref<18x576xf32, #tpu.memory_space<vmem>>, %arg18: memref<1x256xf32, #tpu.memory_space<vmem>>) attributes {dimension_semantics = [#tpu.dimension_semantics<parallel>], iteration_bounds = array<i64: 2>, scalar_prefetch = 0 : i64, scratch_operands = 3 : i64, tpu.core_type = #tpu.core_type<tc>, window_params = [{transform_indices = @transform_0, window_bounds = array<i64: 1, 32, 256>}, {pipeline_mode = #tpu.pipeline_mode<synchronous>, transform_indices = @transform_1, window_bounds = array<i64: 1, 576>}, {pipeline_mode = #tpu.pipeline_mode<synchronous>, transform_indices = @transform_2, window_bounds = array<i64: 32, 2>}, {pipeline_mode = #tpu.pipeline_mode<synchronous>, transform_indices = @transform_3, window_bounds = array<i64: 1, 2>}, {pipeline_mode = #tpu.pipeline_mode<synchronous>, transform_indices = @transform_4, window_bounds = array<i64: 32, 2>}, {pipeline_mode = #tpu.pipeline_mode<synchronous>, transform_indices = @transform_5, window_bounds = array<i64: 32, 1>}, {pipeline_mode = #tpu.pipeline_mode<synchronous>, transform_indices = @transform_6, window_bounds = array<i64: 2, 32>}, {pipeline_mode = #tpu.pipeline_mode<synchronous>, transform_indices = @transform_7, window_bounds = array<i64: 2, 1>}, {pipeline_mode = #tpu.pipeline_mode<synchronous>, transform_indices = @transform_8, window_bounds = array<i64: 2, 18>}, {pipeline_mode = #tpu.pipeline_mode<synchronous>, transform_indices = @transform_9, window_bounds = array<i64: 2, 1>}, {pipeline_mode = #tpu.pipeline_mode<synchronous>, transform_indices = @transform_10, window_bounds = array<i64: 2, 18>}, {pipeline_mode = #tpu.pipeline_mode<synchronous>, transform_indices = @transform_11, window_bounds = array<i64: 2, 1>}, {pipeline_mode = #tpu.pipeline_mode<synchronous>, transform_indices = @transform_12, window_bounds = array<i64: 2, 1>}, {pipeline_mode = #tpu.pipeline_mode<synchronous>, transform_indices = @transform_13, window_bounds = array<i64: 1, 1>}, {transform_indices = @transform_14, window_bounds = array<i64: 1, 32, 256>}]} {
    %c0 = arith.constant 0 : index
    %c0_0 = arith.constant 0 : index
    %c0_1 = arith.constant 0 : index
    %0 = vector.load %arg1[%c0, %c0_0, %c0_1] : memref<1x32x256xf32, #tpu.memory_space<vmem>>, vector<1x32x256xf32>
    %1 = vector.shape_cast %0 : vector<1x32x256xf32> to vector<32x256xf32>
    %cst = arith.constant dense<0.000000e+00> : vector<32xf32>
    %2 = vector.multi_reduction <add>, %1, %cst [1] : vector<32x256xf32> to vector<32xf32>
    %3 = vector.shape_cast %2 : vector<32xf32> to vector<32x1xf32>
    %cst_2 = arith.constant 2.560000e+02 : f32
    %4 = vector.broadcast %cst_2 : f32 to vector<32x1xf32>
    %5 = arith.divf %3, %4 : vector<32x1xf32>
    %c0_3 = arith.constant 0 : index
    %c0_4 = arith.constant 0 : index
    %6 = vector.load %arg3[%c0_3, %c0_4] : memref<32x2xf32, #tpu.memory_space<vmem>>, vector<32x2xf32>
    %7 = vector.broadcast %5 : vector<32x1xf32> to vector<32x2xf32>
    %8 = arith.mulf %6, %7 : vector<32x2xf32>
    %cst_5 = arith.constant dense<0.000000e+00> : vector<2xf32>
    %9 = vector.multi_reduction <add>, %8, %cst_5 [0] : vector<32x2xf32> to vector<2xf32>
    %10 = vector.shape_cast %9 : vector<2xf32> to vector<1x2xf32>
    %c0_6 = arith.constant 0 : index
    %c0_7 = arith.constant 0 : index
    %11 = vector.load %arg4[%c0_6, %c0_7] : memref<1x2xf32, #tpu.memory_space<vmem>>, vector<1x2xf32>
    %12 = arith.addf %10, %11 : vector<1x2xf32>
    %cst_8 = arith.constant 0.000000e+00 : f32
    %13 = vector.broadcast %cst_8 : f32 to vector<1x2xf32>
    %14 = arith.maximumf %12, %13 : vector<1x2xf32>
    %c0_9 = arith.constant 0 : index
    %c0_10 = arith.constant 0 : index
    %15 = vector.load %arg5[%c0_9, %c0_10] : memref<32x2xf32, #tpu.memory_space<vmem>>, vector<32x2xf32>
    %16 = vector.broadcast %14 : vector<1x2xf32> to vector<32x2xf32>
    %17 = arith.mulf %15, %16 : vector<32x2xf32>
    %cst_11 = arith.constant dense<0.000000e+00> : vector<32xf32>
    %18 = vector.multi_reduction <add>, %17, %cst_11 [1] : vector<32x2xf32> to vector<32xf32>
    %19 = vector.shape_cast %18 : vector<32xf32> to vector<32x1xf32>
    %c0_12 = arith.constant 0 : index
    %c0_13 = arith.constant 0 : index
    %20 = vector.load %arg6[%c0_12, %c0_13] : memref<32x1xf32, #tpu.memory_space<vmem>>, vector<32x1xf32>
    %21 = arith.addf %19, %20 : vector<32x1xf32>
    %cst_14 = arith.constant 0.000000e+00 : f32
    %22 = vector.broadcast %cst_14 : f32 to vector<32x1xf32>
    %23 = arith.maximumf %21, %22 : vector<32x1xf32>
    %c0_15 = arith.constant 0 : index
    %c0_16 = arith.constant 0 : index
    %24 = vector.load %arg7[%c0_15, %c0_16] : memref<2x32xbf16, #tpu.memory_space<vmem>>, vector<2x32xbf16>
    %25 = arith.truncf %1 : vector<32x256xf32> to vector<32x256xbf16>
    %cst_17 = arith.constant dense<0.000000e+00> : vector<2x256xf32>
    %26 = tpu.matmul %24, %25, %cst_17 {dimension_numbers = #tpu.dot_dimension_numbers<[1], [0], [0], [1], [0, 0, 1, 1], [], []>} : vector<2x32xbf16>, vector<32x256xbf16>, vector<2x256xf32> -> vector<2x256xf32>
    %c0_18 = arith.constant 0 : index
    %c0_19 = arith.constant 0 : index
    %27 = vector.load %arg8[%c0_18, %c0_19] : memref<2x1xf32, #tpu.memory_space<vmem>>, vector<2x1xf32>
    %28 = vector.broadcast %27 : vector<2x1xf32> to vector<2x256xf32>
    %29 = arith.addf %26, %28 : vector<2x256xf32>
    %cst_20 = arith.constant 0.000000e+00 : f32
    %30 = vector.broadcast %cst_20 : f32 to vector<2x256xf32>
    %31 = arith.maximumf %29, %30 : vector<2x256xf32>
    %cst_21 = arith.constant 0.000000e+00 : f32
    %32 = vector.broadcast %cst_21 : f32 to vector<2x776xf32>
    %c0_22 = arith.constant 0 : index
    %c0_23 = arith.constant 0 : index
    %33 = vector.load %arg16[%c0_22, %c0_23] : memref<2x776xf32, #tpu.memory_space<vmem>>, vector<2x776xf32>
    tpu.vector_store %arg16[%c0_22, %c0_23], %32 {strides = array<i32>} : memref<2x776xf32, #tpu.memory_space<vmem>>, vector<2x776xf32>,
    %34 = vector.extract_strided_slice %31 {offsets = [0, 0], sizes = [2, 16], strides = [1, 1]} : vector<2x256xf32> to vector<2x16xf32>
    %c0_24 = arith.constant 0 : index
    %c200 = arith.constant 200 : index
    %35 = vector.load %arg16[%c0_24, %c200] : memref<2x776xf32, #tpu.memory_space<vmem>>, vector<2x16xf32>
    tpu.vector_store %arg16[%c0_24, %c200], %34 {strides = array<i32>} : memref<2x776xf32, #tpu.memory_space<vmem>>, vector<2x16xf32>,
    %36 = vector.extract_strided_slice %31 {offsets = [0, 16], sizes = [2, 16], strides = [1, 1]} : vector<2x256xf32> to vector<2x16xf32>
    %c0_25 = arith.constant 0 : index
    %c224 = arith.constant 224 : index
    %37 = vector.load %arg16[%c0_25, %c224] : memref<2x776xf32, #tpu.memory_space<vmem>>, vector<2x16xf32>
    tpu.vector_store %arg16[%c0_25, %c224], %36 {strides = array<i32>} : memref<2x776xf32, #tpu.memory_space<vmem>>, vector<2x16xf32>,
    %38 = vector.extract_strided_slice %31 {offsets = [0, 32], sizes = [2, 16], strides = [1, 1]} : vector<2x256xf32> to vector<2x16xf32>
    %c0_26 = arith.constant 0 : index
    %c248 = arith.constant 248 : index
    %39 = vector.load %arg16[%c0_26, %c248] : memref<2x776xf32, #tpu.memory_space<vmem>>, vector<2x16xf32>
    tpu.vector_store %arg16[%c0_26, %c248], %38 {strides = array<i32>} : memref<2x776xf32, #tpu.memory_space<vmem>>, vector<2x16xf32>,
    %40 = vector.extract_strided_slice %31 {offsets = [0, 48], sizes = [2, 16], strides = [1, 1]} : vector<2x256xf32> to vector<2x16xf32>
    %c0_27 = arith.constant 0 : index
    %c272 = arith.constant 272 : index
    %41 = vector.load %arg16[%c0_27, %c272] : memref<2x776xf32, #tpu.memory_space<vmem>>, vector<2x16xf32>
    tpu.vector_store %arg16[%c0_27, %c272], %40 {strides = array<i32>} : memref<2x776xf32, #tpu.memory_space<vmem>>, vector<2x16xf32>,
    %42 = vector.extract_strided_slice %31 {offsets = [0, 64], sizes = [2, 16], strides = [1, 1]} : vector<2x256xf32> to vector<2x16xf32>
    %c0_28 = arith.constant 0 : index
    %c296 = arith.constant 296 : index
    %43 = vector.load %arg16[%c0_28, %c296] : memref<2x776xf32, #tpu.memory_space<vmem>>, vector<2x16xf32>
    tpu.vector_store %arg16[%c0_28, %c296], %42 {strides = array<i32>} : memref<2x776xf32, #tpu.memory_space<vmem>>, vector<2x16xf32>,
    %44 = vector.extract_strided_slice %31 {offsets = [0, 80], sizes = [2, 16], strides = [1, 1]} : vector<2x256xf32> to vector<2x16xf32>
    %c0_29 = arith.constant 0 : index
    %c320 = arith.constant 320 : index
    %45 = vector.load %arg16[%c0_29, %c320] : memref<2x776xf32, #tpu.memory_space<vmem>>, vector<2x16xf32>
    tpu.vector_store %arg16[%c0_29, %c320], %44 {strides = array<i32>} : memref<2x776xf32, #tpu.memory_space<vmem>>, vector<2x16xf32>,
    %46 = vector.extract_strided_slice %31 {offsets = [0, 96], sizes = [2, 16], strides = [1, 1]} : vector<2x256xf32> to vector<2x16xf32>
    %c0_30 = arith.constant 0 : index
    %c344 = arith.constant 344 : index
    %47 = vector.load %arg16[%c0_30, %c344] : memref<2x776xf32, #tpu.memory_space<vmem>>, vector<2x16xf32>
    tpu.vector_store %arg16[%c0_30, %c344], %46 {strides = array<i32>} : memref<2x776xf32, #tpu.memory_space<vmem>>, vector<2x16xf32>,
    %48 = vector.extract_strided_slice %31 {offsets = [0, 112], sizes = [2, 16], strides = [1, 1]} : vector<2x256xf32> to vector<2x16xf32>
    %c0_31 = arith.constant 0 : index
    %c368 = arith.constant 368 : index
    %49 = vector.load %arg16[%c0_31, %c368] : memref<2x776xf32, #tpu.memory_space<vmem>>, vector<2x16xf32>
    tpu.vector_store %arg16[%c0_31, %c368], %48 {strides = array<i32>} : memref<2x776xf32, #tpu.memory_space<vmem>>, vector<2x16xf32>,
    %50 = vector.extract_strided_slice %31 {offsets = [0, 128], sizes = [2, 16], strides = [1, 1]} : vector<2x256xf32> to vector<2x16xf32>
    %c0_32 = arith.constant 0 : index
    %c392 = arith.constant 392 : index
    %51 = vector.load %arg16[%c0_32, %c392] : memref<2x776xf32, #tpu.memory_space<vmem>>, vector<2x16xf32>
    tpu.vector_store %arg16[%c0_32, %c392], %50 {strides = array<i32>} : memref<2x776xf32, #tpu.memory_space<vmem>>, vector<2x16xf32>,
    %52 = vector.extract_strided_slice %31 {offsets = [0, 144], sizes = [2, 16], strides = [1, 1]} : vector<2x256xf32> to vector<2x16xf32>
    %c0_33 = arith.constant 0 : index
    %c416 = arith.constant 416 : index
    %53 = vector.load %arg16[%c0_33, %c416] : memref<2x776xf32, #tpu.memory_space<vmem>>, vector<2x16xf32>
    tpu.vector_store %arg16[%c0_33, %c416], %52 {strides = array<i32>} : memref<2x776xf32, #tpu.memory_space<vmem>>, vector<2x16xf32>,
    %54 = vector.extract_strided_slice %31 {offsets = [0, 160], sizes = [2, 16], strides = [1, 1]} : vector<2x256xf32> to vector<2x16xf32>
    %c0_34 = arith.constant 0 : index
    %c440 = arith.constant 440 : index
    %55 = vector.load %arg16[%c0_34, %c440] : memref<2x776xf32, #tpu.memory_space<vmem>>, vector<2x16xf32>
    tpu.vector_store %arg16[%c0_34, %c440], %54 {strides = array<i32>} : memref<2x776xf32, #tpu.memory_space<vmem>>, vector<2x16xf32>,
    %56 = vector.extract_strided_slice %31 {offsets = [0, 176], sizes = [2, 16], strides = [1, 1]} : vector<2x256xf32> to vector<2x16xf32>
    %c0_35 = arith.constant 0 : index
    %c464 = arith.constant 464 : index
    %57 = vector.load %arg16[%c0_35, %c464] : memref<2x776xf32, #tpu.memory_space<vmem>>, vector<2x16xf32>
    tpu.vector_store %arg16[%c0_35, %c464], %56 {strides = array<i32>} : memref<2x776xf32, #tpu.memory_space<vmem>>, vector<2x16xf32>,
    %58 = vector.extract_strided_slice %31 {offsets = [0, 192], sizes = [2, 16], strides = [1, 1]} : vector<2x256xf32> to vector<2x16xf32>
    %c0_36 = arith.constant 0 : index
    %c488 = arith.constant 488 : index
    %59 = vector.load %arg16[%c0_36, %c488] : memref<2x776xf32, #tpu.memory_space<vmem>>, vector<2x16xf32>
    tpu.vector_store %arg16[%c0_36, %c488], %58 {strides = array<i32>} : memref<2x776xf32, #tpu.memory_space<vmem>>, vector<2x16xf32>,
    %60 = vector.extract_strided_slice %31 {offsets = [0, 208], sizes = [2, 16], strides = [1, 1]} : vector<2x256xf32> to vector<2x16xf32>
    %c0_37 = arith.constant 0 : index
    %c512 = arith.constant 512 : index
    %61 = vector.load %arg16[%c0_37, %c512] : memref<2x776xf32, #tpu.memory_space<vmem>>, vector<2x16xf32>
    tpu.vector_store %arg16[%c0_37, %c512], %60 {strides = array<i32>} : memref<2x776xf32, #tpu.memory_space<vmem>>, vector<2x16xf32>,
    %62 = vector.extract_strided_slice %31 {offsets = [0, 224], sizes = [2, 16], strides = [1, 1]} : vector<2x256xf32> to vector<2x16xf32>
    %c0_38 = arith.constant 0 : index
    %c536 = arith.constant 536 : index
    %63 = vector.load %arg16[%c0_38, %c536] : memref<2x776xf32, #tpu.memory_space<vmem>>, vector<2x16xf32>
    tpu.vector_store %arg16[%c0_38, %c536], %62 {strides = array<i32>} : memref<2x776xf32, #tpu.memory_space<vmem>>, vector<2x16xf32>,
    %64 = vector.extract_strided_slice %31 {offsets = [0, 240], sizes = [2, 16], strides = [1, 1]} : vector<2x256xf32> to vector<2x16xf32>
    %c0_39 = arith.constant 0 : index
    %c560 = arith.constant 560 : index
    %65 = vector.load %arg16[%c0_39, %c560] : memref<2x776xf32, #tpu.memory_space<vmem>>, vector<2x16xf32>
    tpu.vector_store %arg16[%c0_39, %c560], %64 {strides = array<i32>} : memref<2x776xf32, #tpu.memory_space<vmem>>, vector<2x16xf32>,
    %c0_40 = arith.constant 0 : index
    %c0_41 = arith.constant 0 : index
    %66 = vector.load %arg2[%c0_40, %c0_41] : memref<1x576xf32, #tpu.memory_space<vmem>>, vector<1x576xf32>
    %c0_42 = arith.constant 0 : index
    %c0_43 = arith.constant 0 : index
    %67 = vector.load %arg16[%c0_42, %c0_43] : memref<2x776xf32, #tpu.memory_space<vmem>>, vector<2x576xf32>
    %c0_44 = arith.constant 0 : index
    %c0_45 = arith.constant 0 : index
    %68 = vector.load %arg17[%c0_44, %c0_45] : memref<18x576xf32, #tpu.memory_space<vmem>>, vector<2x576xf32>
    tpu.vector_store %arg17[%c0_44, %c0_45], %67 {strides = array<i32>} : memref<18x576xf32, #tpu.memory_space<vmem>>, vector<2x576xf32>,
    %c0_46 = arith.constant 0 : index
    %c4 = arith.constant 4 : index
    %69 = vector.load %arg16[%c0_46, %c4] : memref<2x776xf32, #tpu.memory_space<vmem>>, vector<2x576xf32>
    %c2 = arith.constant 2 : index
    %c0_47 = arith.constant 0 : index
    %70 = vector.load %arg17[%c2, %c0_47] : memref<18x576xf32, #tpu.memory_space<vmem>>, vector<2x576xf32>
    tpu.vector_store %arg17[%c2, %c0_47], %69 {strides = array<i32>} : memref<18x576xf32, #tpu.memory_space<vmem>>, vector<2x576xf32>,
    %c0_48 = arith.constant 0 : index
    %c8 = arith.constant 8 : index
    %71 = vector.load %arg16[%c0_48, %c8] : memref<2x776xf32, #tpu.memory_space<vmem>>, vector<2x576xf32>
    %c4_49 = arith.constant 4 : index
    %c0_50 = arith.constant 0 : index
    %72 = vector.load %arg17[%c4_49, %c0_50] : memref<18x576xf32, #tpu.memory_space<vmem>>, vector<2x576xf32>
    tpu.vector_store %arg17[%c4_49, %c0_50], %71 {strides = array<i32>} : memref<18x576xf32, #tpu.memory_space<vmem>>, vector<2x576xf32>,
    %c0_51 = arith.constant 0 : index
    %c96 = arith.constant 96 : index
    %73 = vector.load %arg16[%c0_51, %c96] : memref<2x776xf32, #tpu.memory_space<vmem>>, vector<2x576xf32>
    %c6 = arith.constant 6 : index
    %c0_52 = arith.constant 0 : index
    %74 = vector.load %arg17[%c6, %c0_52] : memref<18x576xf32, #tpu.memory_space<vmem>>, vector<2x576xf32>
    tpu.vector_store %arg17[%c6, %c0_52], %73 {strides = array<i32>} : memref<18x576xf32, #tpu.memory_space<vmem>>, vector<2x576xf32>,
    %c0_53 = arith.constant 0 : index
    %c100 = arith.constant 100 : index
    %75 = vector.load %arg16[%c0_53, %c100] : memref<2x776xf32, #tpu.memory_space<vmem>>, vector<2x576xf32>
    %c8_54 = arith.constant 8 : index
    %c0_55 = arith.constant 0 : index
    %76 = vector.load %arg17[%c8_54, %c0_55] : memref<18x576xf32, #tpu.memory_space<vmem>>, vector<2x576xf32>
    tpu.vector_store %arg17[%c8_54, %c0_55], %75 {strides = array<i32>} : memref<18x576xf32, #tpu.memory_space<vmem>>, vector<2x576xf32>,
    %c0_56 = arith.constant 0 : index
    %c104 = arith.constant 104 : index
    %77 = vector.load %arg16[%c0_56, %c104] : memref<2x776xf32, #tpu.memory_space<vmem>>, vector<2x576xf32>
    %c10 = arith.constant 10 : index
    %c0_57 = arith.constant 0 : index
    %78 = vector.load %arg17[%c10, %c0_57] : memref<18x576xf32, #tpu.memory_space<vmem>>, vector<2x576xf32>
    tpu.vector_store %arg17[%c10, %c0_57], %77 {strides = array<i32>} : memref<18x576xf32, #tpu.memory_space<vmem>>, vector<2x576xf32>,
    %c0_58 = arith.constant 0 : index
    %c192 = arith.constant 192 : index
    %79 = vector.load %arg16[%c0_58, %c192] : memref<2x776xf32, #tpu.memory_space<vmem>>, vector<2x576xf32>
    %c12 = arith.constant 12 : index
    %c0_59 = arith.constant 0 : index
    %80 = vector.load %arg17[%c12, %c0_59] : memref<18x576xf32, #tpu.memory_space<vmem>>, vector<2x576xf32>
    tpu.vector_store %arg17[%c12, %c0_59], %79 {strides = array<i32>} : memref<18x576xf32, #tpu.memory_space<vmem>>, vector<2x576xf32>,
    %c0_60 = arith.constant 0 : index
    %c196 = arith.constant 196 : index
    %81 = vector.load %arg16[%c0_60, %c196] : memref<2x776xf32, #tpu.memory_space<vmem>>, vector<2x576xf32>
    %c14 = arith.constant 14 : index
    %c0_61 = arith.constant 0 : index
    %82 = vector.load %arg17[%c14, %c0_61] : memref<18x576xf32, #tpu.memory_space<vmem>>, vector<2x576xf32>
    tpu.vector_store %arg17[%c14, %c0_61], %81 {strides = array<i32>} : memref<18x576xf32, #tpu.memory_space<vmem>>, vector<2x576xf32>,
    %c0_62 = arith.constant 0 : index
    %c200_63 = arith.constant 200 : index
    %83 = vector.load %arg16[%c0_62, %c200_63] : memref<2x776xf32, #tpu.memory_space<vmem>>, vector<2x576xf32>
    %c16 = arith.constant 16 : index
    %c0_64 = arith.constant 0 : index
    %84 = vector.load %arg17[%c16, %c0_64] : memref<18x576xf32, #tpu.memory_space<vmem>>, vector<2x576xf32>
    tpu.vector_store %arg17[%c16, %c0_64], %83 {strides = array<i32>} : memref<18x576xf32, #tpu.memory_space<vmem>>, vector<2x576xf32>,
    %c0_65 = arith.constant 0 : index
    %c0_66 = arith.constant 0 : index
    %85 = vector.load %arg9[%c0_65, %c0_66] : memref<2x18xbf16, #tpu.memory_space<vmem>>, vector<2x18xbf16>
    %c0_67 = arith.constant 0 : index
    %c0_68 = arith.constant 0 : index
    %86 = vector.load %arg17[%c0_67, %c0_68] : memref<18x576xf32, #tpu.memory_space<vmem>>, vector<18x576xf32>
    %87 = arith.truncf %86 : vector<18x576xf32> to vector<18x576xbf16>
    %cst_69 = arith.constant dense<0.000000e+00> : vector<2x576xf32>
    %88 = tpu.matmul %85, %87, %cst_69 {dimension_numbers = #tpu.dot_dimension_numbers<[1], [0], [0], [1], [0, 0, 1, 1], [], []>} : vector<2x18xbf16>, vector<18x576xbf16>, vector<2x576xf32> -> vector<2x576xf32>
    %c0_70 = arith.constant 0 : index
    %c0_71 = arith.constant 0 : index
    %89 = vector.load %arg10[%c0_70, %c0_71] : memref<2x1xf32, #tpu.memory_space<vmem>>, vector<2x1xf32>
    %90 = vector.broadcast %89 : vector<2x1xf32> to vector<2x576xf32>
    %91 = arith.addf %88, %90 : vector<2x576xf32>
    %cst_72 = arith.constant 0.000000e+00 : f32
    %92 = vector.broadcast %cst_72 : f32 to vector<2x576xf32>
    %93 = arith.maximumf %91, %92 : vector<2x576xf32>
    %94 = vector.broadcast %66 : vector<1x576xf32> to vector<2x576xf32>
    %95 = arith.mulf %94, %93 : vector<2x576xf32>
    %c0_73 = arith.constant 0 : index
    %c100_74 = arith.constant 100 : index
    %96 = vector.load %arg16[%c0_73, %c100_74] : memref<2x776xf32, #tpu.memory_space<vmem>>, vector<2x576xf32>
    tpu.vector_store %arg16[%c0_73, %c100_74], %95 {strides = array<i32>} : memref<2x776xf32, #tpu.memory_space<vmem>>, vector<2x576xf32>,
    %c0_75 = arith.constant 0 : index
    %c0_76 = arith.constant 0 : index
    %97 = vector.load %arg16[%c0_75, %c0_76] : memref<2x776xf32, #tpu.memory_space<vmem>>, vector<2x576xf32>
    %c0_77 = arith.constant 0 : index
    %c0_78 = arith.constant 0 : index
    %98 = vector.load %arg17[%c0_77, %c0_78] : memref<18x576xf32, #tpu.memory_space<vmem>>, vector<2x576xf32>
    tpu.vector_store %arg17[%c0_77, %c0_78], %97 {strides = array<i32>} : memref<18x576xf32, #tpu.memory_space<vmem>>, vector<2x576xf32>,
    %c0_79 = arith.constant 0 : index
    %c4_80 = arith.constant 4 : index
    %99 = vector.load %arg16[%c0_79, %c4_80] : memref<2x776xf32, #tpu.memory_space<vmem>>, vector<2x576xf32>
    %c2_81 = arith.constant 2 : index
    %c0_82 = arith.constant 0 : index
    %100 = vector.load %arg17[%c2_81, %c0_82] : memref<18x576xf32, #tpu.memory_space<vmem>>, vector<2x576xf32>
    tpu.vector_store %arg17[%c2_81, %c0_82], %99 {strides = array<i32>} : memref<18x576xf32, #tpu.memory_space<vmem>>, vector<2x576xf32>,
    %c0_83 = arith.constant 0 : index
    %c8_84 = arith.constant 8 : index
    %101 = vector.load %arg16[%c0_83, %c8_84] : memref<2x776xf32, #tpu.memory_space<vmem>>, vector<2x576xf32>
    %c4_85 = arith.constant 4 : index
    %c0_86 = arith.constant 0 : index
    %102 = vector.load %arg17[%c4_85, %c0_86] : memref<18x576xf32, #tpu.memory_space<vmem>>, vector<2x576xf32>
    tpu.vector_store %arg17[%c4_85, %c0_86], %101 {strides = array<i32>} : memref<18x576xf32, #tpu.memory_space<vmem>>, vector<2x576xf32>,
    %c0_87 = arith.constant 0 : index
    %c96_88 = arith.constant 96 : index
    %103 = vector.load %arg16[%c0_87, %c96_88] : memref<2x776xf32, #tpu.memory_space<vmem>>, vector<2x576xf32>
    %c6_89 = arith.constant 6 : index
    %c0_90 = arith.constant 0 : index
    %104 = vector.load %arg17[%c6_89, %c0_90] : memref<18x576xf32, #tpu.memory_space<vmem>>, vector<2x576xf32>
    tpu.vector_store %arg17[%c6_89, %c0_90], %103 {strides = array<i32>} : memref<18x576xf32, #tpu.memory_space<vmem>>, vector<2x576xf32>,
    %c0_91 = arith.constant 0 : index
    %c100_92 = arith.constant 100 : index
    %105 = vector.load %arg16[%c0_91, %c100_92] : memref<2x776xf32, #tpu.memory_space<vmem>>, vector<2x576xf32>
    %c8_93 = arith.constant 8 : index
    %c0_94 = arith.constant 0 : index
    %106 = vector.load %arg17[%c8_93, %c0_94] : memref<18x576xf32, #tpu.memory_space<vmem>>, vector<2x576xf32>
    tpu.vector_store %arg17[%c8_93, %c0_94], %105 {strides = array<i32>} : memref<18x576xf32, #tpu.memory_space<vmem>>, vector<2x576xf32>,
    %c0_95 = arith.constant 0 : index
    %c104_96 = arith.constant 104 : index
    %107 = vector.load %arg16[%c0_95, %c104_96] : memref<2x776xf32, #tpu.memory_space<vmem>>, vector<2x576xf32>
    %c10_97 = arith.constant 10 : index
    %c0_98 = arith.constant 0 : index
    %108 = vector.load %arg17[%c10_97, %c0_98] : memref<18x576xf32, #tpu.memory_space<vmem>>, vector<2x576xf32>
    tpu.vector_store %arg17[%c10_97, %c0_98], %107 {strides = array<i32>} : memref<18x576xf32, #tpu.memory_space<vmem>>, vector<2x576xf32>,
    %c0_99 = arith.constant 0 : index
    %c192_100 = arith.constant 192 : index
    %109 = vector.load %arg16[%c0_99, %c192_100] : memref<2x776xf32, #tpu.memory_space<vmem>>, vector<2x576xf32>
    %c12_101 = arith.constant 12 : index
    %c0_102 = arith.constant 0 : index
    %110 = vector.load %arg17[%c12_101, %c0_102] : memref<18x576xf32, #tpu.memory_space<vmem>>, vector<2x576xf32>
    tpu.vector_store %arg17[%c12_101, %c0_102], %109 {strides = array<i32>} : memref<18x576xf32, #tpu.memory_space<vmem>>, vector<2x576xf32>,
    %c0_103 = arith.constant 0 : index
    %c196_104 = arith.constant 196 : index
    %111 = vector.load %arg16[%c0_103, %c196_104] : memref<2x776xf32, #tpu.memory_space<vmem>>, vector<2x576xf32>
    %c14_105 = arith.constant 14 : index
    %c0_106 = arith.constant 0 : index
    %112 = vector.load %arg17[%c14_105, %c0_106] : memref<18x576xf32, #tpu.memory_space<vmem>>, vector<2x576xf32>
    tpu.vector_store %arg17[%c14_105, %c0_106], %111 {strides = array<i32>} : memref<18x576xf32, #tpu.memory_space<vmem>>, vector<2x576xf32>,
    %c0_107 = arith.constant 0 : index
    %c200_108 = arith.constant 200 : index
    %113 = vector.load %arg16[%c0_107, %c200_108] : memref<2x776xf32, #tpu.memory_space<vmem>>, vector<2x576xf32>
    %c16_109 = arith.constant 16 : index
    %c0_110 = arith.constant 0 : index
    %114 = vector.load %arg17[%c16_109, %c0_110] : memref<18x576xf32, #tpu.memory_space<vmem>>, vector<2x576xf32>
    tpu.vector_store %arg17[%c16_109, %c0_110], %113 {strides = array<i32>} : memref<18x576xf32, #tpu.memory_space<vmem>>, vector<2x576xf32>,
    %c0_111 = arith.constant 0 : index
    %c0_112 = arith.constant 0 : index
    %115 = vector.load %arg11[%c0_111, %c0_112] : memref<2x18xbf16, #tpu.memory_space<vmem>>, vector<2x18xbf16>
    %c0_113 = arith.constant 0 : index
    %c0_114 = arith.constant 0 : index
    %116 = vector.load %arg17[%c0_113, %c0_114] : memref<18x576xf32, #tpu.memory_space<vmem>>, vector<18x576xf32>
    %117 = arith.truncf %116 : vector<18x576xf32> to vector<18x576xbf16>
    %cst_115 = arith.constant dense<0.000000e+00> : vector<2x576xf32>
    %118 = tpu.matmul %115, %117, %cst_115 {dimension_numbers = #tpu.dot_dimension_numbers<[1], [0], [0], [1], [0, 0, 1, 1], [], []>} : vector<2x18xbf16>, vector<18x576xbf16>, vector<2x576xf32> -> vector<2x576xf32>
    %c0_116 = arith.constant 0 : index
    %c0_117 = arith.constant 0 : index
    %119 = vector.load %arg12[%c0_116, %c0_117] : memref<2x1xf32, #tpu.memory_space<vmem>>, vector<2x1xf32>
    %120 = vector.broadcast %119 : vector<2x1xf32> to vector<2x576xf32>
    %121 = arith.addf %118, %120 : vector<2x576xf32>
    %cst_118 = arith.constant 0.000000e+00 : f32
    %122 = vector.broadcast %cst_118 : f32 to vector<2x576xf32>
    %123 = arith.maximumf %121, %122 : vector<2x576xf32>
    %124 = vector.broadcast %66 : vector<1x576xf32> to vector<2x576xf32>
    %125 = arith.mulf %124, %123 : vector<2x576xf32>
    %c0_119 = arith.constant 0 : index
    %c100_120 = arith.constant 100 : index
    %126 = vector.load %arg16[%c0_119, %c100_120] : memref<2x776xf32, #tpu.memory_space<vmem>>, vector<2x576xf32>
    tpu.vector_store %arg16[%c0_119, %c100_120], %125 {strides = array<i32>} : memref<2x776xf32, #tpu.memory_space<vmem>>, vector<2x576xf32>,
    %c0_121 = arith.constant 0 : index
    %c100_122 = arith.constant 100 : index
    %127 = vector.load %arg16[%c0_121, %c100_122] : memref<2x776xf32, #tpu.memory_space<vmem>>, vector<2x576xf32>
    %c0_123 = arith.constant 0 : index
    %c0_124 = arith.constant 0 : index
    %128 = vector.load %arg13[%c0_123, %c0_124] : memref<2x1xf32, #tpu.memory_space<vmem>>, vector<2x1xf32>
    %129 = vector.broadcast %128 : vector<2x1xf32> to vector<2x576xf32>
    %130 = arith.mulf %127, %129 : vector<2x576xf32>
    %cst_125 = arith.constant dense<0.000000e+00> : vector<576xf32>
    %131 = vector.multi_reduction <add>, %130, %cst_125 [0] : vector<2x576xf32> to vector<576xf32>
    %132 = vector.shape_cast %131 : vector<576xf32> to vector<1x576xf32>
    %c0_126 = arith.constant 0 : index
    %c0_127 = arith.constant 0 : index
    %133 = vector.load %arg14[%c0_126, %c0_127] : memref<1x1xf32, #tpu.memory_space<vmem>>, vector<1x1xf32>
    %134 = vector.broadcast %133 : vector<1x1xf32> to vector<1x576xf32>
    %135 = arith.addf %132, %134 : vector<1x576xf32>
    %cst_128 = arith.constant 0.000000e+00 : f32
    %136 = vector.broadcast %cst_128 : f32 to vector<1x576xf32>
    %137 = arith.maximumf %135, %136 : vector<1x576xf32>
    %138 = vector.extract_strided_slice %137 {offsets = [0, 100], sizes = [1, 16], strides = [1, 1]} : vector<1x576xf32> to vector<1x16xf32>
    %c0_129 = arith.constant 0 : index
    %c0_130 = arith.constant 0 : index
    %139 = vector.load %arg18[%c0_129, %c0_130] : memref<1x256xf32, #tpu.memory_space<vmem>>, vector<1x16xf32>
    tpu.vector_store %arg18[%c0_129, %c0_130], %138 {strides = array<i32>} : memref<1x256xf32, #tpu.memory_space<vmem>>, vector<1x16xf32>,
    %140 = vector.extract_strided_slice %137 {offsets = [0, 124], sizes = [1, 16], strides = [1, 1]} : vector<1x576xf32> to vector<1x16xf32>
    %c0_131 = arith.constant 0 : index
    %c16_132 = arith.constant 16 : index
    %141 = vector.load %arg18[%c0_131, %c16_132] : memref<1x256xf32, #tpu.memory_space<vmem>>, vector<1x16xf32>
    tpu.vector_store %arg18[%c0_131, %c16_132], %140 {strides = array<i32>} : memref<1x256xf32, #tpu.memory_space<vmem>>, vector<1x16xf32>,
    %142 = vector.extract_strided_slice %137 {offsets = [0, 148], sizes = [1, 16], strides = [1, 1]} : vector<1x576xf32> to vector<1x16xf32>
    %c0_133 = arith.constant 0 : index
    %c32 = arith.constant 32 : index
    %143 = vector.load %arg18[%c0_133, %c32] : memref<1x256xf32, #tpu.memory_space<vmem>>, vector<1x16xf32>
    tpu.vector_store %arg18[%c0_133, %c32], %142 {strides = array<i32>} : memref<1x256xf32, #tpu.memory_space<vmem>>, vector<1x16xf32>,
    %144 = vector.extract_strided_slice %137 {offsets = [0, 172], sizes = [1, 16], strides = [1, 1]} : vector<1x576xf32> to vector<1x16xf32>
    %c0_134 = arith.constant 0 : index
    %c48 = arith.constant 48 : index
    %145 = vector.load %arg18[%c0_134, %c48] : memref<1x256xf32, #tpu.memory_space<vmem>>, vector<1x16xf32>
    tpu.vector_store %arg18[%c0_134, %c48], %144 {strides = array<i32>} : memref<1x256xf32, #tpu.memory_space<vmem>>, vector<1x16xf32>,
    %146 = vector.extract_strided_slice %137 {offsets = [0, 196], sizes = [1, 16], strides = [1, 1]} : vector<1x576xf32> to vector<1x16xf32>
    %c0_135 = arith.constant 0 : index
    %c64 = arith.constant 64 : index
    %147 = vector.load %arg18[%c0_135, %c64] : memref<1x256xf32, #tpu.memory_space<vmem>>, vector<1x16xf32>
    tpu.vector_store %arg18[%c0_135, %c64], %146 {strides = array<i32>} : memref<1x256xf32, #tpu.memory_space<vmem>>, vector<1x16xf32>,
    %148 = vector.extract_strided_slice %137 {offsets = [0, 220], sizes = [1, 16], strides = [1, 1]} : vector<1x576xf32> to vector<1x16xf32>
    %c0_136 = arith.constant 0 : index
    %c80 = arith.constant 80 : index
    %149 = vector.load %arg18[%c0_136, %c80] : memref<1x256xf32, #tpu.memory_space<vmem>>, vector<1x16xf32>
    tpu.vector_store %arg18[%c0_136, %c80], %148 {strides = array<i32>} : memref<1x256xf32, #tpu.memory_space<vmem>>, vector<1x16xf32>,
    %150 = vector.extract_strided_slice %137 {offsets = [0, 244], sizes = [1, 16], strides = [1, 1]} : vector<1x576xf32> to vector<1x16xf32>
    %c0_137 = arith.constant 0 : index
    %c96_138 = arith.constant 96 : index
    %151 = vector.load %arg18[%c0_137, %c96_138] : memref<1x256xf32, #tpu.memory_space<vmem>>, vector<1x16xf32>
    tpu.vector_store %arg18[%c0_137, %c96_138], %150 {strides = array<i32>} : memref<1x256xf32, #tpu.memory_space<vmem>>, vector<1x16xf32>,
    %152 = vector.extract_strided_slice %137 {offsets = [0, 268], sizes = [1, 16], strides = [1, 1]} : vector<1x576xf32> to vector<1x16xf32>
    %c0_139 = arith.constant 0 : index
    %c112 = arith.constant 112 : index
    %153 = vector.load %arg18[%c0_139, %c112] : memref<1x256xf32, #tpu.memory_space<vmem>>, vector<1x16xf32>
    tpu.vector_store %arg18[%c0_139, %c112], %152 {strides = array<i32>} : memref<1x256xf32, #tpu.memory_space<vmem>>, vector<1x16xf32>,
    %154 = vector.extract_strided_slice %137 {offsets = [0, 292], sizes = [1, 16], strides = [1, 1]} : vector<1x576xf32> to vector<1x16xf32>
    %c0_140 = arith.constant 0 : index
    %c128 = arith.constant 128 : index
    %155 = vector.load %arg18[%c0_140, %c128] : memref<1x256xf32, #tpu.memory_space<vmem>>, vector<1x16xf32>
    tpu.vector_store %arg18[%c0_140, %c128], %154 {strides = array<i32>} : memref<1x256xf32, #tpu.memory_space<vmem>>, vector<1x16xf32>,
    %156 = vector.extract_strided_slice %137 {offsets = [0, 316], sizes = [1, 16], strides = [1, 1]} : vector<1x576xf32> to vector<1x16xf32>
    %c0_141 = arith.constant 0 : index
    %c144 = arith.constant 144 : index
    %157 = vector.load %arg18[%c0_141, %c144] : memref<1x256xf32, #tpu.memory_space<vmem>>, vector<1x16xf32>
    tpu.vector_store %arg18[%c0_141, %c144], %156 {strides = array<i32>} : memref<1x256xf32, #tpu.memory_space<vmem>>, vector<1x16xf32>,
    %158 = vector.extract_strided_slice %137 {offsets = [0, 340], sizes = [1, 16], strides = [1, 1]} : vector<1x576xf32> to vector<1x16xf32>
    %c0_142 = arith.constant 0 : index
    %c160 = arith.constant 160 : index
    %159 = vector.load %arg18[%c0_142, %c160] : memref<1x256xf32, #tpu.memory_space<vmem>>, vector<1x16xf32>
    tpu.vector_store %arg18[%c0_142, %c160], %158 {strides = array<i32>} : memref<1x256xf32, #tpu.memory_space<vmem>>, vector<1x16xf32>,
    %160 = vector.extract_strided_slice %137 {offsets = [0, 364], sizes = [1, 16], strides = [1, 1]} : vector<1x576xf32> to vector<1x16xf32>
    %c0_143 = arith.constant 0 : index
    %c176 = arith.constant 176 : index
    %161 = vector.load %arg18[%c0_143, %c176] : memref<1x256xf32, #tpu.memory_space<vmem>>, vector<1x16xf32>
    tpu.vector_store %arg18[%c0_143, %c176], %160 {strides = array<i32>} : memref<1x256xf32, #tpu.memory_space<vmem>>, vector<1x16xf32>,
    %162 = vector.extract_strided_slice %137 {offsets = [0, 388], sizes = [1, 16], strides = [1, 1]} : vector<1x576xf32> to vector<1x16xf32>
    %c0_144 = arith.constant 0 : index
    %c192_145 = arith.constant 192 : index
    %163 = vector.load %arg18[%c0_144, %c192_145] : memref<1x256xf32, #tpu.memory_space<vmem>>, vector<1x16xf32>
    tpu.vector_store %arg18[%c0_144, %c192_145], %162 {strides = array<i32>} : memref<1x256xf32, #tpu.memory_space<vmem>>, vector<1x16xf32>,
    %164 = vector.extract_strided_slice %137 {offsets = [0, 412], sizes = [1, 16], strides = [1, 1]} : vector<1x576xf32> to vector<1x16xf32>
    %c0_146 = arith.constant 0 : index
    %c208 = arith.constant 208 : index
    %165 = vector.load %arg18[%c0_146, %c208] : memref<1x256xf32, #tpu.memory_space<vmem>>, vector<1x16xf32>
    tpu.vector_store %arg18[%c0_146, %c208], %164 {strides = array<i32>} : memref<1x256xf32, #tpu.memory_space<vmem>>, vector<1x16xf32>,
    %166 = vector.extract_strided_slice %137 {offsets = [0, 436], sizes = [1, 16], strides = [1, 1]} : vector<1x576xf32> to vector<1x16xf32>
    %c0_147 = arith.constant 0 : index
    %c224_148 = arith.constant 224 : index
    %167 = vector.load %arg18[%c0_147, %c224_148] : memref<1x256xf32, #tpu.memory_space<vmem>>, vector<1x16xf32>
    tpu.vector_store %arg18[%c0_147, %c224_148], %166 {strides = array<i32>} : memref<1x256xf32, #tpu.memory_space<vmem>>, vector<1x16xf32>,
    %168 = vector.extract_strided_slice %137 {offsets = [0, 460], sizes = [1, 16], strides = [1, 1]} : vector<1x576xf32> to vector<1x16xf32>
    %c0_149 = arith.constant 0 : index
    %c240 = arith.constant 240 : index
    %169 = vector.load %arg18[%c0_149, %c240] : memref<1x256xf32, #tpu.memory_space<vmem>>, vector<1x16xf32>
    tpu.vector_store %arg18[%c0_149, %c240], %168 {strides = array<i32>} : memref<1x256xf32, #tpu.memory_space<vmem>>, vector<1x16xf32>,
    %c0_150 = arith.constant 0 : index
    %c0_151 = arith.constant 0 : index
    %170 = vector.load %arg18[%c0_150, %c0_151] : memref<1x256xf32, #tpu.memory_space<vmem>>, vector<1x256xf32>
    %171 = vector.broadcast %23 : vector<32x1xf32> to vector<32x256xf32>
    %172 = vector.broadcast %170 : vector<1x256xf32> to vector<32x256xf32>
    %173 = arith.addf %171, %172 : vector<32x256xf32>
    %174 = arith.negf %173 : vector<32x256xf32>
    %175 = math.exp %174 : vector<32x256xf32>
    %cst_152 = arith.constant 1.000000e+00 : f32
    %176 = vector.broadcast %cst_152 : f32 to vector<32x256xf32>
    %177 = arith.addf %176, %175 : vector<32x256xf32>
    %178 = arith.divf %176, %177 : vector<32x256xf32>
    %179 = arith.mulf %1, %178 : vector<32x256xf32>
    %180 = arith.addf %1, %179 : vector<32x256xf32>
    %c0_153 = arith.constant 0 : index
    %c0_154 = arith.constant 0 : index
    %c0_155 = arith.constant 0 : index
    %181 = vector.load %arg15[%c0_153, %c0_154, %c0_155] : memref<1x32x256xf32, #tpu.memory_space<vmem>>, vector<1x32x256xf32>
    %182 = vector.shape_cast %181 : vector<1x32x256xf32> to vector<32x256xf32>
    %183 = vector.shape_cast %180 : vector<32x256xf32> to vector<1x32x256xf32>
    tpu.vector_store %arg15[%c0_153, %c0_154, %c0_155], %183 {strides = array<i32>} : memref<1x32x256xf32, #tpu.memory_space<vmem>>, vector<1x32x256xf32>,
    return
  }
  func.func @transform_0(%arg0: i32) -> (i32, i32, i32) {
    %c0_i32 = arith.constant 0 : i32
    %c0_i32_0 = arith.constant 0 : i32
    %c0_i32_1 = arith.constant 0 : i32
    return %arg0, %c0_i32, %c0_i32_0 : i32, i32, i32
  }
  func.func @transform_1(%arg0: i32) -> (i32, i32) {
    %c0_i32 = arith.constant 0 : i32
    %c0_i32_0 = arith.constant 0 : i32
    %c0_i32_1 = arith.constant 0 : i32
    return %c0_i32, %c0_i32_0 : i32, i32
  }
  func.func @transform_2(%arg0: i32) -> (i32, i32) {
    %c0_i32 = arith.constant 0 : i32
    %c0_i32_0 = arith.constant 0 : i32
    %c0_i32_1 = arith.constant 0 : i32
    return %c0_i32, %c0_i32_0 : i32, i32
  }
  func.func @transform_3(%arg0: i32) -> (i32, i32) {
    %c0_i32 = arith.constant 0 : i32
    %c0_i32_0 = arith.constant 0 : i32
    %c0_i32_1 = arith.constant 0 : i32
    return %c0_i32, %c0_i32_0 : i32, i32
  }
  func.func @transform_4(%arg0: i32) -> (i32, i32) {
    %c0_i32 = arith.constant 0 : i32
    %c0_i32_0 = arith.constant 0 : i32
    %c0_i32_1 = arith.constant 0 : i32
    return %c0_i32, %c0_i32_0 : i32, i32
  }
  func.func @transform_5(%arg0: i32) -> (i32, i32) {
    %c0_i32 = arith.constant 0 : i32
    %c0_i32_0 = arith.constant 0 : i32
    %c0_i32_1 = arith.constant 0 : i32
    return %c0_i32, %c0_i32_0 : i32, i32
  }
  func.func @transform_6(%arg0: i32) -> (i32, i32) {
    %c0_i32 = arith.constant 0 : i32
    %c0_i32_0 = arith.constant 0 : i32
    %c0_i32_1 = arith.constant 0 : i32
    return %c0_i32, %c0_i32_0 : i32, i32
  }
  func.func @transform_7(%arg0: i32) -> (i32, i32) {
    %c0_i32 = arith.constant 0 : i32
    %c0_i32_0 = arith.constant 0 : i32
    %c0_i32_1 = arith.constant 0 : i32
    return %c0_i32, %c0_i32_0 : i32, i32
  }
  func.func @transform_8(%arg0: i32) -> (i32, i32) {
    %c0_i32 = arith.constant 0 : i32
    %c0_i32_0 = arith.constant 0 : i32
    %c0_i32_1 = arith.constant 0 : i32
    return %c0_i32, %c0_i32_0 : i32, i32
  }
  func.func @transform_9(%arg0: i32) -> (i32, i32) {
    %c0_i32 = arith.constant 0 : i32
    %c0_i32_0 = arith.constant 0 : i32
    %c0_i32_1 = arith.constant 0 : i32
    return %c0_i32, %c0_i32_0 : i32, i32
  }
  func.func @transform_10(%arg0: i32) -> (i32, i32) {
    %c0_i32 = arith.constant 0 : i32
    %c0_i32_0 = arith.constant 0 : i32
    %c0_i32_1 = arith.constant 0 : i32
    return %c0_i32, %c0_i32_0 : i32, i32
  }
  func.func @transform_11(%arg0: i32) -> (i32, i32) {
    %c0_i32 = arith.constant 0 : i32
    %c0_i32_0 = arith.constant 0 : i32
    %c0_i32_1 = arith.constant 0 : i32
    return %c0_i32, %c0_i32_0 : i32, i32
  }
  func.func @transform_12(%arg0: i32) -> (i32, i32) {
    %c0_i32 = arith.constant 0 : i32
    %c0_i32_0 = arith.constant 0 : i32
    %c0_i32_1 = arith.constant 0 : i32
    return %c0_i32, %c0_i32_0 : i32, i32
  }
  func.func @transform_13(%arg0: i32) -> (i32, i32) {
    %c0_i32 = arith.constant 0 : i32
    %c0_i32_0 = arith.constant 0 : i32
    %c0_i32_1 = arith.constant 0 : i32
    return %c0_i32, %c0_i32_0 : i32, i32
  }
  func.func @transform_14(%arg0: i32) -> (i32, i32, i32) {
    %c0_i32 = arith.constant 0 : i32
    %c0_i32_0 = arith.constant 0 : i32
    %c0_i32_1 = arith.constant 0 : i32
    return %arg0, %c0_i32, %c0_i32_0 : i32, i32, i32
  }
}

</mosaic_0001>

<bundles_post_ra>
// kernel: tpu_custom_call.1
= control target key start
LH: loop header
LB: loop body
LE: loop exit
PB: predicated region body
PF: predicated region fallthrough
CT: control target
= control target key end

     0   :  { %s3986_s0 = inlined_call_operand.hbm [shape: f32[2,32,256], index: 0, kind: input, shape index: {}]   ;;  %s3987_s1 = inlined_call_operand.vmem [shape: f32[1,576], index: 1, kind: input, shape index: {}]   ;;  %s3988_s2 = inlined_call_operand.vmem [shape: f32[32,2], index: 2, kind: input, shape index: {}]   ;;  %s3989_s3 = inlined_call_operand.vmem [shape: f32[1,2], index: 3, kind: input, shape index: {}]   ;;  %s3990_s4 = inlined_call_operand.vmem [shape: f32[32,2], index: 4, kind: input, shape index: {}]   ;;  %s3991_s5 = inlined_call_operand.vmem [shape: f32[32,1], index: 5, kind: input, shape index: {}]   ;;  %s3992_s6 = inlined_call_operand.vmem [shape: bf16[2,32], index: 6, kind: input, shape index: {}]   ;;  %s3993_s7 = inlined_call_operand.vmem [shape: f32[2,1], index: 7, kind: input, shape index: {}]   ;;  %s3994_s8 = inlined_call_operand.vmem [shape: bf16[2,18], index: 8, kind: input, shape index: {}]   ;;  %s3995_s9 = inlined_call_operand.vmem [shape: f32[2,1], index: 9, kind: input, shape index: {}]   ;;  %s3996_s10 = inlined_call_operand.vmem [shape: bf16[2,18], index: 10, kind: input, shape index: {}]   ;;  %s3997_s11 = inlined_call_operand.vmem [shape: f32[2,1], index: 11, kind: input, shape index: {}]   ;;  %s3998_s12 = inlined_call_operand.vmem [shape: f32[2,1], index: 12, kind: input, shape index: {}]   ;;  %s3999_s13 = inlined_call_operand.<no memory space> [shape: f32[1,1], index: 13, kind: input, shape index: {}]   ;;  %s4000_s14 = inlined_call_operand.hbm [shape: f32[2,32,256], index: 14, kind: output, shape index: {}]  }
   0x1   :  { %v19_v0 = vstv %s3999_s13 }
   0x2   :  { %20 = vst [vmem:[#allocation5] sm:$0x1] %v19_v0 }
   0x3   :  { %21 = vsyncpa [#allocation7], 0 }
   0x4   :  { %23 = vsyncpa [#allocation7 + $0x1], 0 }
   0x5   :  { %24 = vsyncpa [#allocation8], 0 }
   0x6   :  { %26 = vsyncpa [#allocation8 + $0x1], 0  ;;  %s3059_s15 = smov 0   ;;  %s3061_s16 = smov 0  }
   0x7   :  { %s3063_s17 = smov 0   ;;  %s3065_s18 = smov 0  }
   0x8 LB: > { %4039 = sst [smem:[#allocation12_spill]] %s2937_s15  ;;  %s3080_s13 = sadd.s32 4294967295, %s2949_s18   ;;  %s2949_s18 = sphi %s3065_s18, %s4141_s18   ;;  %s2945_s17 = sphi %s3063_s17, %s4143_s17   ;;  %s2941_s16 = sphi %s3061_s16, %s4145_s16   ;;  %s2937_s15 = sphi %s3059_s15, %s4144_s15  }
   0x9   : > { %4040 = sst [smem:[#allocation13_spill]] %s2945_s17  ;;  %s2651_s19 = sadd.s32 4294967294, %s2949_s18  }
   0xa   : > { %s3084_s20 = sadd.s32 1, %s2949_s18   ;;  %s39_s21 = sadd.s32 1, %s2945_s17 }
   0xb   : > { %4041 = sst [smem:[#allocation14_spill]] %s3084_s20  ;;  %s36_s22 = ssub.s32 %s2949_s18, %s3084_s20 }
   0xc   : > { %p46_p0 = scmp.ne.s32.totalorder %s2945_s17, %s2941_s16  ;;  %p37_p1 = scmp.eq.s32.totalorder %s36_s22, 0 }
   0xd   : > { %p47_p2 = scmp.eq.s32.totalorder %s2949_s18, 0  ;;  %p52_p3 = scmp.ne.s32.totalorder %s2941_s16, %s2937_s15 }
   0xe   : > { %p53_p4 = scmp.eq.s32.totalorder %s3080_s13, 0  ;;  %p349_p7 = scmp.eq.s32.totalorder %s3080_s13, 1 }
   0xf   : > { %s3096_s23 = scalar_select %p37_p1, %s2945_s17, %s39_s21  }
  0x10   : > { %p3098_p5 = por %p47_p2, %p46_p0  ;;  %p3102_p6 = por %p53_p4, %p52_p3 }
  0x11   : > { %4042 = sst [smem:[#allocation15_spill]] %s3096_s23  ;;  %p355_p8 = scmp.eq.s32.totalorder %s2651_s19, 1 }
  0x12   : > { %p2734_p10 = scmp.lt.s32.totalorder %s2949_s18, 2  ;;  %p3109_p11 = por %p349_p7, %p46_p0 }
  0x13   : > { %p3113_p12 = por %p355_p8, %p52_p3  ;;  %s414_s28 = sand.u32 1, %s2945_s17  }
  0x14   : > { %s4045_s26 = scalar_select %p3109_p11, 1, 0 }
  0x15   : > { %s4046_s27 = scalar_select %p3113_p12, 1, 0 }
  0x16   : > { %s2698_s29 = sshll.u32 %s2949_s18, 10  ;;  %s2654_s30 = sshll.u32 %s414_s28, 6 }
  0x17   : > { %s3122_s23 = scalar_lea.hbm %s3986_s0, %s2698_s29  ;;  %s418_s19 = scalar_lea.vmem [#allocation6], %s2654_s30 }
  0x18   : > { %s425_s20 = sshll.u32 %s418_s19, 4  ;;  %p3126_p13 = pnand %p2734_p10, %p3098_p5  ;;  %s3130_s20 = int_to_ptr.vmem [resolvable:$true] %s425_s20 }
  0x19   : > { %s3132_s17 = scalar_lea.sflag [#allocation7], %s414_s28  ;;  %s2853_s21 = scalar_lea.hbm %s3122_s23, 1024 }
  0x1a   : > { %p2854_p0 = scmp.ne.s32.totalorder %s3122_s23, %s2853_s21  ;;  %p2855_p1 = pneg %p3126_p13 }
  0x1b   : > { %s2858_s30 = scalar_lea.hbm %s3986_s0, 2048  ;;  %p2859_p4 = scmp.lt.u32.totalorder %s3122_s23, %s3986_s0 }
  0x1c   : > { %p2856_p2 = pnand %p2855_p1, %p2854_p0  ;;  %p2860_p5 = scmp.lt.u32.totalorder %s2858_s30, %s2853_s21 }
  0x1d   : > { %p2862_p8 = scmp.lt.u32.totalorder %s2853_s21, %s3122_s23 }
  0x1e   : > { %p2857_p3 = pneg %p2856_p2  ;;  %p2861_p7 = por %p2860_p5, %p2859_p4 }
  0x20   : > { %p2863_p10 = por %p2862_p8, %p2861_p7 }
  0x22   : > { %p2864_p9 = pnand %p2863_p10, %p2857_p3 }
  0x24   : > { %2867 = shalt.err (!%p2864_p9)
}
  0x25   : > { %s2868_s28 = scalar_lea.vmem %s3130_s20, 1024  ;;  %s2951_s29 = smov [#allocation6]  }
  0x26   : > { %p2869_p0 = scmp.ne.s32.totalorder %s3130_s20, %s2868_s28  ;;  %s2873_s24 = sshll.u32 %s2951_s29, 4  ;;  %s2874_s24 = int_to_ptr.vmem [resolvable:$false] %s2873_s24 }
  0x27   : > { %s2875_s22 = scalar_lea.vmem %s2874_s24, 2048  ;;  %p2876_p11 = scmp.lt.s32.totalorder %s3130_s20, %s2874_s24 }
  0x28   : > { %p2871_p2 = pnand %p2869_p0, %p2855_p1  ;;  %p2877_p4 = scmp.lt.s32.totalorder %s2875_s22, %s2868_s28 }
  0x2a   : > { %p2872_p12 = pneg %p2871_p2  ;;  %p2878_p5 = por %p2877_p4, %p2876_p11 }
  0x2c   : > { %p2879_p7 = pnand %p2878_p5, %p2872_p12 }
  0x2e   : > { %2882 = shalt.err (!%p2879_p7)
}
  0x2f   : > { %s2952_s21 = smov 256   ;;  %s2953_s30 = smov 16  }
  0x30   : > { %2729 = dma.hbm_to_vmem [thread:$0]  (!%p3126_p13), %s3122_s23, 1024, %s3130_s20, %s3132_s17, %s2952_s21, %s2952_s21, %s2953_s30  }
  0x31   : > { %p2657_p9 = scmp.ge.s32.totalorder %s2949_s18, 1  ;;  %p433_p1 = scmp.lt.s32.totalorder %s2949_s18, 3 }
  0x33   : > { %p434_p3 = pnand %p2657_p9, %p433_p1 }
  0x34   : > { %s3163_s19 = sand.u32 (!%p434_p3), 1, %s2941_s16  }
  0x35   : > { %437 = sbr.rel (%p434_p3) target bundleno = 1820 (0x71c), region = 76  ;;  %s4006_s28 = sshll.u32 (!%p434_p3), %s3163_s19, 6 }
  0x36   : > { %s440_s29 = scalar_lea.sflag (!%p434_p3), [#allocation7], %s3163_s19  ;;  %s3169_s24 = scalar_lea.vmem (!%p434_p3), [#allocation6], %s4006_s28 }
  0x3c   : > { %2928 = dma.done.wait (%p3102_p6), %s440_s29, 1024  }
  0x3d   : > { %2930 = vsyncadd (%p3102_p6), %s440_s29, 4294966272  ;;  %vm634_vm0 = vcmask 1041408   ;;  %v2954_v1 = vmov 0   ;;  %vm635_vm1 = vcmask 1043458   ;;  %vm637_vm2 = vcmask 62468   ;;  %v490_v3 = vld [vmem:[%s3169_s24 + $0x8] sm:$0xff] }
  0x3e   : > { %622 = vmatprep.mubr.bf16.mxu0 %v2954_v1  ;;  %2796 = vset.pattern.permute.xlu0 %v2954_v1  ;;  %v2955_v2 = vmov 0.0   ;;  %vm636_vm3 = vmor %vm635_vm1, %vm634_vm0  ;;  %v492_v4 = vld [vmem:[%s3169_s24 + $0x18] sm:$0xff]  ;;  %v489_v5 = vld [vmem:[%s3169_s24] sm:$0xff]  ;;  %vm586_vm5 = vcmask 261120   ;;  %s4030_s25 = smov 64   ;;  %v543_v19 = vlaneseq  ;;  %s2958_s22 = smov 56  }
  0x3f   : > { %633 = vst [vmem:[#allocation2] sm:$0xff] %v2955_v2  ;;  %1314 = vmatprep.mubr.bf16.mxu1 %v2954_v1  ;;  %2797 = vset.pattern.permute.xlu1 %v2954_v1  ;;  %vm638_vm4 = vmor %vm637_vm2, %vm636_vm3  ;;  %v577_v6 = vpack.c.bf16 %v492_v4, %v490_v3  ;;  %v491_v7 = vld [vmem:[%s3169_s24 + $0x10] sm:$0xff]  ;;  %v494_v8 = vld [vmem:[%s3169_s24 + $0x28] sm:$0xff]  ;;  %v2957_v21 = vmov 1983009808   ;;  %s4011_s21 = smov 60  }
  0x40   : > { %639 = vst.msk [vmem:[#allocation2 + $0x8] sm:$0x3f] %vm638_vm4, %v2955_v2  ;;  %v496_v9 = vld [vmem:[%s3169_s24 + $0x38] sm:$0xff]  ;;  %v576_v10 = vpack.c.bf16 %v491_v7, %v489_v5  ;;  %v493_v12 = vld [vmem:[%s3169_s24 + $0x20] sm:$0xff]  ;;  %v495_v13 = vld [vmem:[%s3169_s24 + $0x30] sm:$0xff]  ;;  %v3201_v20 = vshrl.u32 %v543_v19, 7  ;;  %v642_v22 = vunpack.c.l.s4 %v2957_v21 }
  0x41   : > { %v579_v11 = vpack.c.bf16 %v496_v9, %v494_v8  ;;  %590 = vmatprep.subr.bf16.mxu0 %v577_v6  ;;  %v580_v14 = vld [vmem:[%s3993_s7] sm:$0x3]  ;;  %v578_v15 = vpack.c.bf16 %v495_v13, %v493_v12  ;;  %vm4028_vm6 = vcmask 521220   ;;  %s4007_s30 = smov 72   ;;  %s4008_s29 = smov 88   ;;  %vm651_vm7 = vcmask 714304  }
  0x42   : > { %591 = vmatpush1.bf16.msra.mxu0 %v576_v10  ;;  %583 = vperm.xlu0 %2796, %v580_v14   ;;  %v575_v18 = vld [vmem:[%s3992_s6] sm:$0x1]  ;;  %v643_v23 = vunpack.c.0.s8 %v642_v22  ;;  %s4009_s15 = smov 80   ;;  %s4010_s17 = smov 96   ;;  %vm664_vm8 = vcmask 1042368   ;;  %vm665_vm9 = vcmask 60418  }
  0x43   : > { %592 = vmatprep.subr.bf16.mxu0 %v579_v11  ;;  %s2964_s20 = smov 120   ;;  %s4013_s23 = smov 104   ;;  %vm661_vm10 = vcmask 719872   ;;  %vm656_vm11 = vcmask 911104   ;;  %vm666_vm12 = vmor %vm665_vm9, %vm664_vm8  ;;  %vm671_vm13 = vcmask 255104   ;;  %vm676_vm14 = vcmask 451904  }
  0x44   : > { %v3204_v24 = vsub.s32 %v643_v23, %v3201_v20  ;;  %s4015_s28 = smov 8   ;;  %vm701_vm15 = vcmask 189504   ;;  %vm681_vm2 = vcmask 648704   ;;  %vm686_vm3 = vcmask 845504   ;;  %p4137_p11 = scmp.ne.s32.totalorder %s4045_s26, 0 }
  0x45   : > { %vm688_vm4 = vcmask 1042304   ;;  %vm726_vm8 = vcmask 123904   ;;  %vm711_vm9 = vcmask 583104  }
  0x46   : > { %593 = vmatpush1.bf16.msra.mxu0 %v578_v15 }
  0x47   : > { %v2666_v16 = vld.sshfl [vmem:[#allocation2 + $0xa] sm:$0x3 pattern:$0x76325410] }
  0x48   : > { %v1089_v17 = vcombine.low %v2666_v16, %v2666_v16  ;;  %v2798_v25 = vld [vmem:[#allocation2 + $0xa] ss:$0 sps:$4 sm:$0xff]  }
  0x49   : > { %2660 = vmatmul.mubr.msk.bf16.vlgmr.msra.gmra.mrb[0].mxu0 %vm586_vm5, %v575_v18  ;;  %v3207_v26 = vrot.slane %v2798_v25, %v3204_v24  ;;  %v3211_v28 = vld.sshfl [vmem:[#allocation2 + $0xa] sm:$0x33 pattern:$0x76325410] }
  0x4a   : > { %1098 = vrot.lane.b32.xlu0 %v1089_v17, %s4030_s25  ;;  %1355 = vmatprep.mubr.bf16.mxu0 %v2954_v1 }
  0x4b   : > { %v1144_v27 = vcombine.low %v3207_v26, %v3207_v26  ;;  %1210 = vrot.lane.b32.xlu1 %v3211_v28, %s2958_s22 }
  0x4e   : > { %1153 = vrot.lane.b32.xlu0 %v1144_v27, %s4011_s21  ;;  %s2971_s21 = smov 32  }
  0xbd   : > { %v3242_v41 = vpop.permute.xlu1 %1210 }
  0xc1   : > { %v584_v29 = vpop.permute.xlu0 %583 }
  0xc5   : > { %v3216_v30 = vpop.permute.xlu0 %1098 }
  0xc6   : > { %1114 = vst.msk [vmem:[#allocation3 + $0x48] sm:$0x30] %vm4028_vm6, %v3216_v30 }
  0xc9   : > { %v3244_v42 = vpop.permute.xlu0 %1153 }
 0x11c   : > { %v624_v31 = vpop.f32.mrb[0].mxu0 }
 0x11d   : > { %v3220_v32 = vadd.f32 %v624_v31, %v584_v29  ;;  %v626_v33 = vpop.f32.mrb[1].mxu0 }
 0x11e   : > { %v628_v34 = vpop.f32.mrb[2].mxu0  ;;  %v627_v38 = vadd.f32 %v626_v33, %v584_v29 }
 0x11f   : > { %v631_v35 = vmax.f32 %v3220_v32, 0.0  ;;  %v629_v36 = vpop.f32.mrb[3].mxu0 }
 0x120   : > { %v632_v39 = vmax.f32 %v627_v38, 0.0 }
 0x121   : > { %v647_v37 = vrot.slane %v631_v35, %v3204_v24 }
 0x122   : > { %v697_v40 = vrot.slane %v632_v39, %v3204_v24  ;;  %v1201_v39 = vcombine.high %v3211_v28, %v3211_v28 }
 0x123   : > { %648 = vrot.lane.b32.xlu1 %v647_v37, %s4007_s30  ;;  %658 = vrot.lane.b32.xlu0 %v647_v37, %s4008_s29  ;;  %s4014_s30 = smov 112   ;;  %s4016_s29 = smov 16  }
 0x127   : > { %653 = vrot.lane.b32.xlu1 %v647_v37, %s4009_s15  ;;  %668 = vrot.lane.b32.xlu0 %v647_v37, %s4010_s17  ;;  %s4019_s15 = smov 48   ;;  %s2970_s17 = smov 24  }
 0x12b   : > { %683 = vrot.lane.b32.xlu1 %v647_v37, %s2964_s20  ;;  %673 = vrot.lane.b32.xlu0 %v647_v37, %s4013_s23  ;;  %s4018_s23 = smov 40  }
 0x12f   : > { %698 = vrot.lane.b32.xlu1 %v697_v40, %s4015_s28  ;;  %678 = vrot.lane.b32.xlu0 %v647_v37, %s4014_s30  ;;  %s2973_s30 = smov 124   ;;  %s2974_s28 = smov 28  }
 0x133   : > { %703 = vrot.lane.b32.xlu1 %v697_v40, %s4016_s29  ;;  %723 = vrot.lane.b32.xlu0 %v697_v40, %s4019_s15  ;;  %s4048_s29 = smov 60   ;;  %s2976_s15 = smov 100  }
 0x137   : > { %708 = vrot.lane.b32.xlu1 %v697_v40, %s2970_s17  ;;  %713 = vrot.lane.b32.xlu0 %v697_v40, %s2971_s21 }
 0x13b   : > { %728 = vrot.lane.b32.xlu1 %v697_v40, %s2958_s22  ;;  %718 = vrot.lane.b32.xlu0 %v697_v40, %s4018_s23  ;;  %s4094_s23 = smov 88  }
 0x13f   : > { %733 = vrot.lane.b32.xlu1 %v697_v40, %s4030_s25  ;;  %v1256_v40 = vld [vmem:[%s3995_s9] sm:$0x3] }
 0x195   : > { %v649_v43 = vpop.permute.xlu1 %648  ;;  %v659_v44 = vpop.permute.xlu0 %658 }
 0x196   : > { %652 = vst.msk [vmem:[#allocation2 + $0x2] sm:$0x3] %vm651_vm7, %v649_v43  ;;  %v660_v45 = vrot.slane %v659_v44, 6  ;;  %vm706_vm7 = vcmask 386304  }
 0x198   : > { %v662_v48 = vsel %vm661_vm10, %v660_v45, %v659_v44  ;;  %vm716_vm10 = vcmask 779904  }
 0x199   : > { %v654_v46 = vpop.permute.xlu1 %653  ;;  %v669_v47 = vpop.permute.xlu0 %668 }
 0x19a   : > { %657 = vst.msk [vmem:[#allocation2 + $0x2] sm:$0x3] %vm656_vm11, %v654_v46  ;;  %vm731_vm11 = vcmask 320704  }
 0x19b   : > { %667 = vst.msk [vmem:[#allocation2 + $0x2] sm:$0xf] %vm666_vm12, %v662_v48  ;;  %vm721_vm12 = vcmask 976704  }
 0x19c   : > { %672 = vst.msk [vmem:[#allocation2 + $0x4] sm:$0x3] %vm671_vm13, %v669_v47  ;;  %vm736_vm13 = vcmask 517504  }
 0x19d   : > { %v684_v49 = vpop.permute.xlu1 %683  ;;  %v674_v50 = vpop.permute.xlu0 %673 }
 0x19e   : > { %677 = vst.msk [vmem:[#allocation2 + $0x4] sm:$0x3] %vm676_vm14, %v674_v50  ;;  %vm776_vm14 = vcmask 517120  }
 0x1a1   : > { %v699_v51 = vpop.permute.xlu1 %698  ;;  %v679_v52 = vpop.permute.xlu0 %678 }
 0x1a2   : > { %702 = vst.msk [vmem:[#allocation2 + $0x6] sm:$0x3] %vm701_vm15, %v699_v51  ;;  %vm4027_vm15 = vcmask 519170  }
 0x1a3   : > { %682 = vst.msk [vmem:[#allocation2 + $0x4] sm:$0x3] %vm681_vm2, %v679_v52  ;;  %vm4026_vm2 = vcmask 490496  }
 0x1a4   : > { %687 = vst.msk [vmem:[#allocation2 + $0x4] sm:$0x3] %vm686_vm3, %v684_v49  ;;  %vm4020_vm3 = vcmask 523270  }
 0x1a5   : > { %689 = vst.msk [vmem:[#allocation2 + $0x4] sm:$0x3] %vm688_vm4, %v631_v35  ;;  %v704_v53 = vpop.permute.xlu1 %703  ;;  %v724_v54 = vpop.permute.xlu0 %723  ;;  %vm872_vm4 = vcmask 982016  }
 0x1a6   : > { %707 = vst.msk [vmem:[#allocation2 + $0x6] sm:$0x3] %vm706_vm7, %v704_v53  ;;  %vm987_vm7 = vcmask 228352  }
 0x1a7   : > { %727 = vst.msk [vmem:[#allocation2 + $0x8] sm:$0x3] %vm726_vm8, %v724_v54  ;;  %vm4025_vm8 = vcmask 523264  }
 0x1a9   : > { %v709_v55 = vpop.permute.xlu1 %708  ;;  %v714_v56 = vpop.permute.xlu0 %713 }
 0x1aa   : > { %712 = vst.msk [vmem:[#allocation2 + $0x6] sm:$0x3] %vm711_vm9, %v709_v55  ;;  %vm817_vm9 = vcmask 1014784  }
 0x1ab   : > { %717 = vst.msk [vmem:[#allocation2 + $0x6] sm:$0x3] %vm716_vm10, %v714_v56  ;;  %vm4029_vm10 = vcmask 195584  }
 0x1ad   : > { %v729_v57 = vpop.permute.xlu1 %728  ;;  %v719_v58 = vpop.permute.xlu0 %718 }
 0x1ae   : > { %732 = vst.msk [vmem:[#allocation2 + $0x8] sm:$0x3] %vm731_vm11, %v729_v57  ;;  %vm4024_vm11 = vcmask 457728  }
 0x1af   : > { %722 = vst.msk [vmem:[#allocation2 + $0x6] sm:$0x3] %vm721_vm12, %v719_v58  ;;  %vm4023_vm12 = vcmask 1040384  }
 0x1b1   : > { %v734_v59 = vpop.permute.xlu1 %733 }
 0x1b2   : > { %737 = vst.msk [vmem:[#allocation2 + $0x8] sm:$0x3] %vm736_vm13, %v734_v59  ;;  %vm4022_vm13 = vcmask 146432  }
 0x1b6   : > { %v739_v60 = vld [vmem:[#allocation2] sm:$0xff] }
 0x1b7   : > { %v743_v61 = vcombine.high %v739_v60, %v739_v60  ;;  %v750_v62 = vrot.slane %v739_v60, %v3204_v24  ;;  %2662 = vst.sshfl [vmem:[#allocation3] sm:$0x3 pattern:$0x76325410] %v739_v60  ;;  %v892_v17 = vcombine.low %v739_v60, %v739_v60 }
 0x1b9   : > { %v3250_v63 = vrot.slane %v743_v61, %v3204_v24  ;;  %v758_v0 = vcombine.high %v750_v62, %v750_v62  ;;  %2663 = vst.sshfl [vmem:[#allocation3 + $0x10] sm:$0x3 pattern:$0x76325410] %v743_v61  ;;  %811 = vrot.lane.b32.xlu1 %v750_v62, %s2973_s30  ;;  %v2801_v9 = vld [vmem:[#allocation2 + $0x8] ss:$0 sps:$4 sm:$0xff]   ;;  %v908_v16 = vcombine.low %v750_v62, %v750_v62 }
 0x1ba   : > { %v3253_v3 = vld.sshfl [vmem:[#allocation2 + $0x8] sm:$0x33 pattern:$0x76325410]  ;;  %v1031_v11 = vrot.slane %v2801_v9, %v3204_v24  ;;  %v899_v21 = vrot.slane %v892_v17, %v3204_v24 }
 0x1bb   : > { %v3257_v4 = vcombine.high %v3250_v63, %v3250_v63  ;;  %773 = vst [vmem:[#allocation3 + $0x8] sm:$0x3] %v758_v0  ;;  %983 = vrot.lane.b32.xlu0 %v3253_v3, %s2974_s28  ;;  %v2664_v5 = vld.sshfl [vmem:[#allocation2 + $0x8] sm:$0x3 pattern:$0x76325410]  ;;  %v853_v32 = vcombine.low %v3250_v63, %v3250_v63  ;;  %v974_v37 = vcombine.high %v3253_v3, %v3253_v3 }
 0x1bc   : > { %777 = vst.msk [vmem:[#allocation3 + $0x20] sm:$0x3] %vm776_vm14, %v2664_v5  ;;  %v861_v6 = vcombine.low %v2664_v5, %v2664_v5  ;;  %v2800_v7 = vld [vmem:[#allocation2 + $0x8] ss:$0 sps:$4 sm:$0x33]   ;;  %v797_v31 = vcombine.high %v899_v21, %v899_v21  ;;  %v907_v33 = vcombine.low %v899_v21, %v899_v21  ;;  %v1032_v38 = vcombine.high %v1031_v11, %v1031_v11 }
 0x1bd   : > { %775 = vst [vmem:[#allocation3 + $0x18] sm:$0x3] %v3257_v4  ;;  %1037 = vrot.lane.b32.xlu1 %v750_v62, %s2970_s17  ;;  %v806_v8 = vrot.slane %v2800_v7, %v3204_v24  ;;  %v1115_v10 = vld [vmem:[#allocation2 + $0x2] sm:$0xff] }
 0x1be   : > { %v2802_v12 = vld [vmem:[#allocation2 + $0x8] ss:$0 sps:$4 sm:$0xff]   ;;  %v1133_v13 = vrot.slane %v1115_v10, %v3204_v24  ;;  %v1119_v22 = vcombine.low %v1115_v10, %v1115_v10  ;;  %v1065_v25 = vcombine.high %v1115_v10, %v1115_v10 }
 0x1bf   : > { %870 = vrot.lane.b32.xlu0 %v861_v6, %s2964_s20  ;;  %v916_v14 = vrot.slane %v2802_v12, %v3204_v24 }
 0x1c0   : > { %v1135_v18 = vcombine.low %v1133_v13, %v1133_v13  ;;  %v1126_v23 = vrot.slane %v1119_v22, %v3204_v24  ;;  %v1192_v27 = vcombine.high %v1133_v13, %v1133_v13  ;;  %v1079_v29 = vrot.slane %v1065_v25, %v3204_v24 }
 0x1c1   : > { %975 = vrot.lane.b32.xlu1 %v750_v62, %s2974_s28  ;;  %v917_v15 = vcombine.low %v916_v14, %v916_v14 }
 0x1c2   : > { %v1081_v34 = vcombine.low %v1079_v29, %v1079_v29  ;;  %v1134_v35 = vcombine.low %v1126_v23, %v1126_v23  ;;  %v1193_v36 = vcombine.high %v1079_v29, %v1079_v29 }
 0x1c3   : > { %815 = vrot.lane.b32.xlu0 %v806_v8, %s2973_s30 }
 0x1c5   : > { %924 = vrot.lane.b32.xlu1 %v750_v62, %s2971_s21 }
 0x1c7   : > { %1041 = vrot.lane.b32.xlu0 %v1031_v11, %s2970_s17 }
 0x1c9   : > { %1151 = vrot.lane.b32.xlu1 %v1133_v13, %s4048_s29 }
 0x1cb   : > { %928 = vrot.lane.b32.xlu0 %v916_v14, %s2971_s21 }
 0x1cd   : > { %1202 = vrot.lane.b32.xlu1 %v1133_v13, %s2958_s22 }
 0x1cf   : > { %926 = vrot.lane.b32.xlu0 %v917_v15, %s2971_s21 }
 0x1d1   : > { %922 = vrot.lane.b32.xlu1 %v908_v16, %s2971_s21 }
 0x1d3   : > { %864 = vrot.lane.b32.xlu0 %v750_v62, %s2964_s20 }
 0x1d5   : > { %979 = vrot.lane.b32.xlu1 %v3250_v63, %s2974_s28 }
 0x1d7   : > { %1092 = vrot.lane.b32.xlu0 %v1133_v13, %s4030_s25 }
 0x1d9   : > { %1149 = vrot.lane.b32.xlu1 %v1135_v18, %s4048_s29 }
 0x1db   : > { %920 = vrot.lane.b32.xlu0 %v899_v21, %s2971_s21 }
 0x1dd   : > { %862 = vrot.lane.b32.xlu1 %v908_v16, %s2964_s20 }
 0x1df   : > { %977 = vrot.lane.b32.xlu0 %v758_v0, %s2974_s28 }
 0x1e1   : > { %1090 = vrot.lane.b32.xlu1 %v1135_v18, %s4030_s25 }
 0x1e3   : > { %1147 = vrot.lane.b32.xlu0 %v1126_v23, %s4048_s29 }
 0x1e5   : > { %813 = vrot.lane.b32.xlu1 %v758_v0, %s2973_s30 }
 0x1e7   : > { %807 = vrot.lane.b32.xlu0 %v899_v21, %s2973_s30 }
 0x1e9   : > { %868 = vrot.lane.b32.xlu1 %v3250_v63, %s2964_s20 }
 0x1eb   : > { %1033 = vrot.lane.b32.xlu0 %v899_v21, %s2970_s17 }
 0x1ed   : > { %1039 = vrot.lane.b32.xlu1 %v758_v0, %s2970_s17 }
 0x1ef   : > { %1204 = vrot.lane.b32.xlu0 %v1192_v27, %s2958_s22 }
 0x1f1   : > { %1096 = vrot.lane.b32.xlu1 %v1079_v29, %s4030_s25 }
 0x1f3   : > { %809 = vrot.lane.b32.xlu0 %v797_v31, %s2973_s30 }
 0x1f5   : > { %1206 = vrot.lane.b32.xlu1 %v1079_v29, %s2958_s22 }
 0x1f7   : > { %1035 = vrot.lane.b32.xlu0 %v797_v31, %s2970_s17 }
 0x1f9   : > { %866 = vrot.lane.b32.xlu1 %v853_v32, %s2964_s20 }
 0x1fb   : > { %918 = vrot.lane.b32.xlu0 %v907_v33, %s2971_s21 }
 0x1fd   : > { %1094 = vrot.lane.b32.xlu1 %v1081_v34, %s4030_s25 }
 0x1ff   : > { %1145 = vrot.lane.b32.xlu0 %v1134_v35, %s4048_s29 }
 0x201   : > { %981 = vrot.lane.b32.xlu1 %v3257_v4, %s2974_s28 }
 0x203   : > { %1208 = vrot.lane.b32.xlu0 %v1193_v36, %s2958_s22 }
 0x205   : > { %985 = vrot.lane.b32.xlu1 %v974_v37, %s2974_s28 }
 0x207   : > { %1043 = vrot.lane.b32.xlu0 %v1032_v38, %s2970_s17 }
 0x209   : > { %1155 = vrot.lane.b32.xlu1 %v3207_v26, %s4048_s29 }
 0x20b   : > { %1212 = vrot.lane.b32.xlu0 %v1201_v39, %s2958_s22 }
 0x20d   : > { %1259 = vperm.xlu1 %2797, %v1256_v40  }
 0x22b   : > { %v3323_v43 = vpop.permute.xlu1 %811 }
 0x22d   : > { %v3325_v44 = vpop.permute.xlu0 %983 }
 0x22f   : > { %v3327_v45 = vpop.permute.xlu1 %1037 }
 0x231   : > { %v871_v46 = vpop.permute.xlu0 %870 }
 0x232   : > { %887 = vst.msk [vmem:[#allocation3 + $0x20] sm:$0x30] %vm4028_vm6, %v871_v46  ;;  %vm1488_vm6 = vcmask 289794  }
 0x233   : > { %v976_v28 = vpop.permute.xlu1 %975 }
 0x235   : > { %v816_v47 = vpop.permute.xlu0 %815 }
 0x236   : > { %832 = vst.msk [vmem:[#allocation3 + $0x20] sm:$0xc] %vm4027_vm15, %v816_v47 }
 0x237   : > { %v925_v26 = vpop.permute.xlu1 %924 }
 0x239   : > { %v3331_v48 = vpop.permute.xlu0 %1041 }
 0x23b   : > { %v1152_v49 = vpop.permute.xlu1 %1151 }
 0x23c   : > { %v1161_v50 = vsel %vm4026_vm2, %v1152_v49, %v3244_v42 }
 0x23d   : > { %1171 = vst [vmem:[#allocation3 + $0x40] sm:$0xc0] %v1161_v50  ;;  %v929_v51 = vpop.permute.xlu0 %928 }
 0x23f   : > { %v1203_v52 = vpop.permute.xlu1 %1202 }
 0x241   : > { %v927_v53 = vpop.permute.xlu0 %926 }
 0x242   : > { %v933_v54 = vsel %vm586_vm5, %v925_v26, %v927_v53  ;;  %v934_v55 = vsel %vm586_vm5, %v927_v53, %v929_v51 }
 0x243   : > { %943 = vst [vmem:[#allocation3 + $0x18] sm:$0xc0] %v933_v54  ;;  %945 = vst.msk [vmem:[#allocation3 + $0x20] sm:$0xc0] %vm4020_vm3, %v934_v55  ;;  %v923_v56 = vpop.permute.xlu1 %922 }
 0x244   : > { %v932_v57 = vsel %vm586_vm5, %v923_v56, %v925_v26 }
 0x245   : > { %942 = vst [vmem:[#allocation3 + $0x10] sm:$0xc0] %v932_v57  ;;  %v3339_v58 = vpop.permute.xlu0 %864 }
 0x247   : > { %v3341_v59 = vpop.permute.xlu1 %979 }
 0x249   : > { %v3343_v60 = vpop.permute.xlu0 %1092 }
 0x24b   : > { %v1150_v61 = vpop.permute.xlu1 %1149 }
 0x24c   : > { %v1160_v62 = vsel %vm4026_vm2, %v1150_v61, %v1152_v49 }
 0x24d   : > { %1170 = vst [vmem:[#allocation3 + $0x38] sm:$0xc0] %v1160_v62  ;;  %v3346_v63 = vpop.permute.xlu0 %920 }
 0x24e   : > { %v931_v0 = vsel %vm586_vm5, %v3346_v63, %v923_v56 }
 0x24f   : > { %941 = vst [vmem:[#allocation3 + $0x8] sm:$0xc0] %v931_v0  ;;  %v863_v3 = vpop.permute.xlu1 %862 }
 0x250   : > { %v873_v4 = vsel %vm872_vm4, %v863_v3, %v3339_v58 }
 0x251   : > { %882 = vst [vmem:[#allocation3] sm:$0x30] %v873_v4  ;;  %v978_v5 = vpop.permute.xlu0 %977 }
 0x252   : > { %v988_v6 = vsel %vm987_vm7, %v976_v28, %v978_v5  ;;  %v989_v7 = vsel %vm987_vm7, %v978_v5, %v3341_v59 }
 0x253   : > { %998 = vst [vmem:[#allocation3 + $0x28] sm:$0x3] %v988_v6  ;;  %999 = vst [vmem:[#allocation3 + $0x30] sm:$0x3] %v989_v7  ;;  %v1091_v8 = vpop.permute.xlu1 %1090 }
 0x254   : > { %v1101_v9 = vsel %vm4025_vm8, %v1091_v8, %v3343_v60 }
 0x255   : > { %1110 = vst [vmem:[#allocation3 + $0x28] sm:$0x30] %v1101_v9  ;;  %v1148_v10 = vpop.permute.xlu0 %1147 }
 0x256   : > { %v1159_v11 = vsel %vm4026_vm2, %v1148_v10, %v1150_v61 }
 0x257   : > { %1169 = vst [vmem:[#allocation3 + $0x30] sm:$0xc0] %v1159_v11  ;;  %v814_v12 = vpop.permute.xlu1 %813 }
 0x258   : > { %v820_v13 = vsel %vm817_vm9, %v3323_v43, %v814_v12  ;;  %v821_v14 = vsel %vm817_vm9, %v814_v12, %v816_v47 }
 0x259   : > { %829 = vst [vmem:[#allocation3 + $0x10] sm:$0xc] %v820_v13  ;;  %830 = vst [vmem:[#allocation3 + $0x18] sm:$0xc] %v821_v14  ;;  %v808_v15 = vpop.permute.xlu0 %807 }
 0x25b   : > { %v869_v16 = vpop.permute.xlu1 %868 }
 0x25c   : > { %v876_v17 = vsel %vm872_vm4, %v869_v16, %v871_v46 }
 0x25d   : > { %885 = vst [vmem:[#allocation3 + $0x18] sm:$0x30] %v876_v17  ;;  %v1034_v18 = vpop.permute.xlu0 %1033 }
 0x25f   : > { %v1040_v21 = vpop.permute.xlu1 %1039 }
 0x260   : > { %v1048_v22 = vsel %vm4029_vm10, %v3327_v45, %v1040_v21  ;;  %v1049_v23 = vsel %vm4029_vm10, %v1040_v21, %v3331_v48 }
 0x261   : > { %1058 = vst [vmem:[#allocation3 + $0x38] sm:$0xc] %v1048_v22  ;;  %1059 = vst [vmem:[#allocation3 + $0x40] sm:$0xc] %v1049_v23  ;;  %v1205_v25 = vpop.permute.xlu0 %1204  ;;  %v1230_v23 = vld [vmem:[%s3994_s8] sm:$0x1] }
 0x262   : > { %v1215_v27 = vsel %vm4024_vm11, %v1203_v52, %v1205_v25 }
 0x263   : > { %1225 = vst [vmem:[#allocation3 + $0x50] sm:$0x3] %v1215_v27  ;;  %v1097_v29 = vpop.permute.xlu1 %1096 }
 0x264   : > { %v1104_v31 = vsel %vm4025_vm8, %v1097_v29, %v3216_v30  ;;  %v1234_v8 = vld [vmem:[#allocation3 + $0x18] sm:$0xff] }
 0x265   : > { %1113 = vst [vmem:[#allocation3 + $0x40] sm:$0x30] %v1104_v31  ;;  %v810_v32 = vpop.permute.xlu0 %809 }
 0x266   : > { %v818_v33 = vsel %vm817_vm9, %v808_v15, %v810_v32  ;;  %v819_v34 = vsel %vm817_vm9, %v810_v32, %v3323_v43 }
 0x267   : > { %827 = vst [vmem:[#allocation3] sm:$0xc] %v818_v33  ;;  %828 = vst [vmem:[#allocation3 + $0x8] sm:$0xc] %v819_v34  ;;  %v1207_v35 = vpop.permute.xlu1 %1206  ;;  %v3422_v34 = vsub.s32 0, %v3201_v20 }
 0x268   : > { %v1216_v36 = vsel %vm4024_vm11, %v1205_v25, %v1207_v35  ;;  %v1235_v25 = vld [vmem:[#allocation3 + $0x20] sm:$0xff] }
 0x269   : > { %1226 = vst [vmem:[#allocation3 + $0x58] sm:$0x3] %v1216_v36  ;;  %v1036_v37 = vpop.permute.xlu0 %1035  ;;  %v738_v36 = vld [vmem:[%s3987_s1] sm:$0x1f] }
 0x26a   : > { %v1046_v38 = vsel %vm4029_vm10, %v1034_v18, %v1036_v37  ;;  %v1047_v39 = vsel %vm4029_vm10, %v1036_v37, %v3327_v45  ;;  %v1241_v0 = vld [vmem:[#allocation3 + $0x50] sm:$0x3]  ;;  %v1416_v37 = vsub.s32 1, %v3201_v20 }
 0x26b   : > { %1056 = vst [vmem:[#allocation3 + $0x28] sm:$0xc] %v1046_v38  ;;  %1057 = vst [vmem:[#allocation3 + $0x30] sm:$0xc] %v1047_v39  ;;  %v867_v30 = vpop.permute.xlu1 %866  ;;  %v1251_v13 = vpack.c.bf16 %v1241_v0, %v1241_v0  ;;  %v1420_v39 = vsub.s32 2, %v3201_v20 }
 0x26c   : > { %v874_v40 = vsel %vm872_vm4, %v3339_v58, %v867_v30  ;;  %v875_v43 = vsel %vm872_vm4, %v867_v30, %v869_v16 }
 0x26d   : > { %883 = vst [vmem:[#allocation3 + $0x8] sm:$0x30] %v874_v40  ;;  %884 = vst [vmem:[#allocation3 + $0x10] sm:$0x30] %v875_v43  ;;  %v919_v46 = vpop.permute.xlu0 %918  ;;  %v1268_v22 = vsel %vm4023_vm12, %v1251_v13, 0  ;;  %v1424_v43 = vsub.s32 3, %v3201_v20 }
 0x26e   : > { %v930_v28 = vsel %vm586_vm5, %v919_v46, %v3346_v63  ;;  %v3431_v46 = vrot.slane %v738_v36, %v3422_v34 }
 0x26f   : > { %940 = vst [vmem:[#allocation3] sm:$0xc0] %v930_v28  ;;  %v1095_v47 = vpop.permute.xlu1 %1094 }
 0x270   : > { %v1102_v26 = vsel %vm4025_vm8, %v3343_v60, %v1095_v47  ;;  %v1103_v45 = vsel %vm4025_vm8, %v1095_v47, %v1097_v29  ;;  %v1242_v63 = vld [vmem:[#allocation3 + $0x58] sm:$0x3]  ;;  %v3435_v47 = vrot.slane %v738_v36, %v1416_v37  ;;  %vm1485_vm8 = vcmask 1047558  }
 0x271   : > { %1111 = vst [vmem:[#allocation3 + $0x30] sm:$0x30] %v1102_v26  ;;  %1112 = vst [vmem:[#allocation3 + $0x38] sm:$0x30] %v1103_v45  ;;  %v1146_v49 = vpop.permute.xlu0 %1145  ;;  %v1252_v9 = vpack.c.bf16 %v1242_v63, %v1242_v63 }
 0x272   : > { %v1158_v50 = vsel %vm4026_vm2, %v1146_v49, %v1148_v10 }
 0x273   : > { %1168 = vst [vmem:[#allocation3 + $0x28] sm:$0xc0] %v1158_v50  ;;  %v982_v51 = vpop.permute.xlu1 %981 }
 0x274   : > { %v990_v52 = vsel %vm987_vm7, %v3341_v59, %v982_v51  ;;  %v991_v53 = vsel %vm987_vm7, %v982_v51, %v3325_v44  ;;  %v1232_v60 = vld [vmem:[#allocation3 + $0x8] sm:$0xff]  ;;  %v1233_v11 = vld [vmem:[#allocation3 + $0x10] sm:$0xff] }
 0x275   : > { %1000 = vst [vmem:[#allocation3 + $0x38] sm:$0x3] %v990_v52  ;;  %1001 = vst [vmem:[#allocation3 + $0x40] sm:$0x3] %v991_v53  ;;  %v1209_v54 = vpop.permute.xlu0 %1208  ;;  %v3437_v52 = vrot.slane %v738_v36, %v1420_v39 }
 0x276   : > { %v1217_v55 = vsel %vm4024_vm11, %v1207_v35, %v1209_v54  ;;  %v1218_v56 = vsel %vm4024_vm11, %v1209_v54, %v3242_v41  ;;  %v1231_v4 = vld [vmem:[#allocation3] sm:$0xff] }
 0x277   : > { %1227 = vst [vmem:[#allocation3 + $0x60] sm:$0x3] %v1217_v55  ;;  %1228 = vst [vmem:[#allocation3 + $0x68] sm:$0x3] %v1218_v56  ;;  %v986_v57 = vpop.permute.xlu1 %985  ;;  %v3439_v55 = vrot.slane %v738_v36, %v1424_v43 }
 0x278   : > { %v992_v58 = vsel %vm987_vm7, %v3325_v44, %v986_v57  ;;  %v1237_v61 = vld [vmem:[#allocation3 + $0x30] sm:$0xff] }
 0x279   : > { %1002 = vst.msk [vmem:[#allocation3 + $0x48] sm:$0x3] %vm776_vm14, %v992_v58  ;;  %v1044_v59 = vpop.permute.xlu0 %1043  ;;  %v1247_v62 = vpack.c.bf16 %v1237_v61, %v1232_v60 }
 0x27a   : > { %v1050_v3 = vsel %vm4029_vm10, %v3331_v48, %v1044_v59  ;;  %v1236_v5 = vld [vmem:[#allocation3 + $0x28] sm:$0xff]  ;;  %vm3461_vm10 = vmor %vm1488_vm6, %vm634_vm0  ;;  %vm4054_vm6 = vcmask 521220  }
 0x27b   : > { %1060 = vst.msk [vmem:[#allocation3 + $0x48] sm:$0xc] %vm4027_vm15, %v1050_v3  ;;  %v1156_v6 = vpop.permute.xlu1 %1155  ;;  %1282 = vmatprep.subr.bf16.mxu1 %v1247_v62  ;;  %v1246_v7 = vpack.c.bf16 %v1236_v5, %v1231_v4  ;;  %v1428_v62 = vsub.s32 4, %v3201_v20 }
 0x27c   : > { %v1162_v44 = vsel %vm4026_vm2, %v3244_v42, %v1156_v6  ;;  %v1239_v10 = vld [vmem:[#allocation3 + $0x40] sm:$0xff]  ;;  %v1238_v12 = vld [vmem:[#allocation3 + $0x38] sm:$0xff]  ;;  %vm1475_vm2 = vcmask 818176  }
 0x27d   : > { %1172 = vst.msk [vmem:[#allocation3 + $0x48] sm:$0xc0] %vm4020_vm3, %v1162_v44  ;;  %1283 = vmatpush1.bf16.msra.mxu1 %v1246_v7  ;;  %v1213_v48 = vpop.permute.xlu0 %1212  ;;  %v1249_v14 = vpack.c.bf16 %v1239_v10, %v1234_v8  ;;  %v1248_v15 = vpack.c.bf16 %v1238_v12, %v1233_v11  ;;  %vm4021_vm3 = vmmov 0   ;;  %v3446_v7 = vrot.slane %v738_v36, %v1428_v62 }
 0x27e   : > { %v1219_v16 = vsel %vm4024_vm11, %v3242_v41, %v1213_v48  ;;  %2668 = vmatprep.subr.msk.bf16.mxu1 %vm4023_vm12, %v1252_v9  ;;  %v1244_v17 = vld [vmem:[#allocation3 + $0x68] sm:$0x3]  ;;  %v1243_v18 = vld [vmem:[#allocation3 + $0x60] sm:$0x3] }
 0x27f   : > { %1229 = vst.msk [vmem:[#allocation3 + $0x70] sm:$0x3] %vm776_vm14, %v1219_v16  ;;  %1323 = vmatprep.subr.bf16.mxu0 %v1249_v14  ;;  %v1254_v42 = vpack.c.bf16 %v1244_v17, %v1244_v17  ;;  %v1253_v21 = vpack.c.bf16 %v1243_v18, %v1243_v18 }
 0x280   : > { %1324 = vmatpush1.bf16.msra.mxu0 %v1248_v15 }
 0x281   : > { %1285 = vmatpush1.bf16.msra.mxu1 %v1268_v22  ;;  %2670 = vmatprep.subr.msk.bf16.mxu0 %vm4023_vm12, %v1254_v42  ;;  %v1274_v41 = vsel %vm4023_vm12, %v1253_v21, 0 }
 0x282   : > { %2706 = vmatprep.subr.bf16.mxu1 %v2955_v2 }
 0x284   : > { %2669 = vmatmul.mubr.msk.bf16.vlgmr.msra.gmra.mrb[0].mxu1 %vm4022_vm13, %v1230_v23  ;;  %1326 = vmatpush1.bf16.msra.mxu0 %v1274_v41  ;;  %v1240_v27 = vld [vmem:[#allocation3 + $0x48] sm:$0xff] }
 0x285   : > { %v1250_v29 = vpack.c.bf16 %v1240_v27, %v1235_v25  ;;  %2710 = vmatprep.mubr.msk.bf16.mxu1 %vm4021_vm3, %v2955_v2  ;;  %vm1481_vm3 = vcmask 1042208  }
 0x286   : > { %v1245_v31 = vld [vmem:[#allocation3 + $0x70] sm:$0x3] }
 0x287   : > { %2671 = vmatmul.mubr.msk.bf16.vlgmr.msra.gmra.mrb[4].mxu0 %vm4022_vm13, %v1230_v23  ;;  %2707 = vmatpush3.bf16.msra.mxu1 %v1250_v29  ;;  %v1255_v32 = vpack.c.bf16 %v1245_v31, %v1245_v31 }
 0x288   : > { %2708 = vmatprep.subr.bf16.mxu1 %v2955_v2  ;;  %2053 = vmatprep.mubr.bf16.mxu0 %v2954_v1 }
 0x289   : > { %v1280_v33 = vsel %vm4023_vm12, %v1255_v32, 0  ;;  %vm1483_vm12 = vcmask 1045508  }
 0x28b   : > { %2709 = vmatpush3.bf16.msra.mxu1 %v1280_v33 }
 0x28c   : > { %v1260_v35 = vpop.permute.xlu1 %1259 }
 0x28e   : > { %2711 = vmatmul.mubr.msk.bf16.vlgmr.msra.gmra.mrb[4].mxu1 %vm4022_vm13, %v1230_v23  ;;  %vm1482_vm13 = vmor %vm635_vm1, %vm1481_vm3  ;;  %vm4053_vm1 = vcmask 195584  }
 0x28f   : > { %2094 = vmatprep.mubr.bf16.mxu1 %v2954_v1  ;;  %vm1484_vm11 = vmor %vm1483_vm12, %vm1482_vm13  ;;  %vm4061_vm13 = vcmask 523264  }
 0x290   : > { %vm3455_vm15 = vmor %vm1485_vm8, %vm1484_vm11 }
 0x291   : > { %vm4055_vm3 = vmmov %vm4054_vm6 }
 0x292   : > { %vm4057_vm8 = vmmov %vm4053_vm1 }
 0x293   : > { %vm4058_vm11 = vmmov %vm4053_vm1 }
 0x294   : > { %vm4059_vm12 = vmmov %vm4053_vm1 }
 0x357   : > { %v1316_v38 = vpop.f32.mrb[0].mxu1 }
 0x358   : > { %v1318_v30 = vpop.f32.mrb[1].mxu1  ;;  %v1317_v40 = vadd.f32 %v1316_v38, %v1260_v35 }
 0x359   : > { %v1320_v1 = vpop.f32.mrb[2].mxu1  ;;  %v1319_v28 = vadd.f32 %v1318_v30, %v1260_v35 }
 0x35a   : > { %v1404_v26 = vmax.f32 %v1317_v40, 0.0  ;;  %v1321_v45 = vpop.f32.mrb[3].mxu1  ;;  %v1357_v49 = vpop.f32.mrb[4].mxu0 }
 0x35b   : > { %v1405_v50 = vmax.f32 %v1319_v28, 0.0  ;;  %v1358_v51 = vadd.f32 %v1357_v49, %v1260_v35  ;;  %v1359_v53 = vpop.f32.mrb[5].mxu0 }
 0x35c   : > { %v1360_v54 = vadd.f32 %v1359_v53, %v1260_v35  ;;  %v1361_v56 = vpop.f32.mrb[6].mxu0  ;;  %v1435_v57 = vmul.f32 %v3431_v46, %v1404_v26 }
 0x35d   : > { %v1406_v58 = vmax.f32 %v1358_v51, 0.0  ;;  %v1362_v60 = vpop.f32.mrb[7].mxu0  ;;  %v1436_v61 = vmul.f32 %v3435_v47, %v1405_v50 }
 0x35e   : > { %v1407_v59 = vmax.f32 %v1360_v54, 0.0 }
 0x35f   : > { %v1437_v63 = vmul.f32 %v3437_v52, %v1406_v58  ;;  %v1445_v0 = vcombine.low %v1435_v57, %v1436_v61 }
 0x360   : > { %v1438_v3 = vmul.f32 %v3439_v55, %v1407_v59 }
 0x361   : > { %v1398_v4 = vpop.f32.mrb[4].mxu1  ;;  %v1453_v8 = vrot.slane %v1445_v0, %v3204_v24 }
 0x362   : > { %v1446_v5 = vcombine.low %v1437_v63, %v1438_v3  ;;  %v1399_v6 = vadd.f32 %v1398_v4, %v1260_v35  ;;  %v2712_v44 = vpop.f32.mrb[5].mxu1 }
 0x363   : > { %v1401_v9 = vpop.f32.mrb[6].mxu1 }
 0x364   : > { %v1408_v10 = vmax.f32 %v1399_v6, 0.0  ;;  %v1460_v11 = vrot.slane %v1446_v5, %v3204_v24  ;;  %v2713_v12 = vpop.f32.mrb[7].mxu1 }
 0x366   : > { %v1439_v13 = vmul.f32 %v3446_v7, %v1408_v10  ;;  %v1461_v48 = vcombine.low %v1453_v8, %v1460_v11 }
 0x368   : > { %1469 = vrot.lane.b32.xlu0 %v1461_v48, %s2976_s15  ;;  %v1468_v14 = vrot.slane %v1439_v13, %v3204_v24  ;;  %v1997_v13 = vld [vmem:[%s3997_s11] sm:$0x3] }
 0x36a   : > { %1471 = vrot.lane.b32.xlu1 %v1468_v14, %s2976_s15 }
 0x3da   : > { %v1470_v15 = vpop.permute.xlu0 %1469 }
 0x3db   : > { %v1473_v17 = vrot.slane %v1470_v15, 6 }
 0x3dc   : > { %v1472_v18 = vpop.permute.xlu1 %1471 }
 0x3dd   : > { %v1476_v42 = vsel %vm1475_vm2, %v1473_v17, %v1470_v15  ;;  %v1474_v21 = vrot.slane %v1472_v18, 6 }
 0x3de   : > { %1487 = vst.msk [vmem:[#allocation2] sm:$0xff] %vm3455_vm15, %v1476_v42 }
 0x3df   : > { %v1477_v23 = vsel %vm634_vm0, %v1473_v17, %v1474_v21  ;;  %v3531_v17 = vld [vmem:[%s3169_s24 + $0x8] sm:$0xff] }
 0x3e0   : > { %v1478_v41 = vsel %vm1475_vm2, %v1477_v23, %v1472_v18  ;;  %v3534_v18 = vld [vmem:[%s3169_s24] sm:$0xff] }
 0x3e1   : > { %1490 = vst.msk [vmem:[#allocation2 + $0x8] sm:$0xf] %vm3461_vm10, %v1478_v41  ;;  %v497_v42 = vadd.f32 %v3534_v18, %v3531_v17  ;;  %v3543_v41 = vld [vmem:[%s3169_s24 + $0x28] sm:$0xff] }
 0x3e5   : > { %v1582_v25 = vld [vmem:[#allocation2] sm:$0xff] }
 0x3e6   : > { %v1593_v27 = vrot.slane %v1582_v25, %v3204_v24  ;;  %v1586_v29 = vcombine.high %v1582_v25, %v1582_v25  ;;  %2674 = vst.sshfl [vmem:[#allocation3] sm:$0x3 pattern:$0x76325410] %v1582_v25  ;;  %v1639_v38 = vcombine.low %v1582_v25, %v1582_v25  ;;  %v3546_v25 = vld [vmem:[%s3169_s24 + $0x20] sm:$0xff] }
 0x3e8   : > { %1613 = vrot.lane.b32.xlu0 %v1593_v27, %s2964_s20  ;;  %1562 = vrot.lane.b32.xlu1 %v1593_v27, %s2973_s30  ;;  %2675 = vst.sshfl [vmem:[#allocation3 + $0x10] sm:$0x3 pattern:$0x76325410] %v1586_v29  ;;  %v1600_v32 = vrot.slane %v1586_v29, %v3204_v24  ;;  %v1549_v33 = vcombine.high %v1593_v27, %v1593_v27  ;;  %v1915_v45 = vld [vmem:[#allocation2 + $0x2] sm:$0xff] }
 0x3e9   : > { %v2676_v31 = vld.sshfl [vmem:[#allocation2 + $0x8] sm:$0x3 pattern:$0x76325410]  ;;  %v1655_v36 = vcombine.low %v1593_v27, %v1593_v27  ;;  %v1646_v39 = vrot.slane %v1639_v38, %v3204_v24  ;;  %v1926_v49 = vrot.slane %v1915_v45, %v3204_v24  ;;  %v1919_v58 = vcombine.high %v1915_v45, %v1915_v45  ;;  %v2812_v3 = vld [vmem:[#allocation2 + $0xa] ss:$0 sps:$4 sm:$0xff]  }
 0x3ea   : > { %1528 = vst.msk [vmem:[#allocation3 + $0x20] sm:$0x3] %vm776_vm14, %v2676_v31  ;;  %v1511_v35 = vcombine.high %v1600_v32, %v1600_v32  ;;  %1525 = vst [vmem:[#allocation3 + $0x8] sm:$0x3] %v1549_v33  ;;  %v1602_v40 = vcombine.low %v1600_v32, %v1600_v32  ;;  %v1610_v43 = vcombine.low %v2676_v31, %v2676_v31  ;;  %v2808_v53 = vld [vmem:[#allocation2 + $0x8] ss:$0 sps:$4 sm:$0xff]  }
 0x3eb   : > { %v2677_v30 = vld.sshfl [vmem:[#allocation2 + $0x8] sm:$0x33 pattern:$0x76325410]  ;;  %v1548_v26 = vcombine.high %v1646_v39, %v1646_v39  ;;  %v1776_v54 = vrot.slane %v2808_v53, %v3204_v24  ;;  %v1878_v56 = vcombine.low %v1926_v49, %v1926_v49  ;;  %v1654_v57 = vcombine.low %v1646_v39, %v1646_v39  ;;  %v3554_v31 = vld [vmem:[%s3169_s24 + $0x10] sm:$0xff] }
 0x3ec   : > { %1671 = vrot.lane.b32.xlu0 %v1593_v27, %s2971_s21  ;;  %1782 = vrot.lane.b32.xlu1 %v1593_v27, %s2970_s17  ;;  %1527 = vst [vmem:[#allocation3 + $0x18] sm:$0x3] %v1511_v35  ;;  %v2678_v1 = vld.sshfl [vmem:[#allocation2 + $0xa] sm:$0x3 pattern:$0x76325410]  ;;  %v1933_v61 = vrot.slane %v1919_v58, %v3204_v24  ;;  %v1862_v62 = vcombine.low %v1915_v45, %v1915_v45 }
 0x3ed   : > { %v1833_v28 = vcombine.low %v2678_v1, %v2678_v1  ;;  %v2807_v50 = vld [vmem:[#allocation2 + $0x8] ss:$0 sps:$4 sm:$0x33]   ;;  %v1934_v4 = vcombine.high %v1926_v49, %v1926_v49  ;;  %v1886_v6 = vrot.slane %v2812_v3, %v3204_v24  ;;  %v1720_v11 = vcombine.high %v2677_v30, %v2677_v30  ;;  %v2197_v3 = vld [vmem:[%s3998_s12] sm:$0x3] }
 0x3ee   : > { %v1557_v51 = vrot.slane %v2807_v50, %v3204_v24  ;;  %v2810_v60 = vld [vmem:[#allocation2 + $0x8] ss:$0 sps:$4 sm:$0xff]   ;;  %v1869_v0 = vrot.slane %v1862_v62, %v3204_v24  ;;  %v1825_v5 = vcombine.low %v1933_v61, %v1933_v61  ;;  %v1935_v9 = vcombine.high %v1933_v61, %v1933_v61  ;;  %v2679_v10 = vld.sshfl [vmem:[#allocation2 + $0xa] sm:$0x33 pattern:$0x76325410] }
 0x3ef   : > { %v1663_v59 = vrot.slane %v2810_v60, %v3204_v24  ;;  %v1887_v44 = vcombine.low %v1886_v6, %v1886_v6  ;;  %v1777_v12 = vcombine.high %v1776_v54, %v1776_v54  ;;  %v1943_v48 = vcombine.high %v2679_v10, %v2679_v10  ;;  %v3551_v29 = vld [vmem:[%s3169_s24 + $0x18] sm:$0xff] }
 0x3f0   : > { %1721 = vrot.lane.b32.xlu1 %v1593_v27, %s2974_s28  ;;  %1564 = vrot.lane.b32.xlu0 %v1549_v33, %s2973_s30  ;;  %v1877_v8 = vcombine.low %v1869_v0, %v1869_v0  ;;  %v503_v27 = vadd.f32 %v3546_v25, %v3543_v41  ;;  %v3560_v38 = vld [vmem:[%s3169_s24 + $0x38] sm:$0xff] }
 0x3f1   : > { %v1664_v63 = vcombine.low %v1663_v59, %v1663_v59 }
 0x3f4   : > { %1669 = vrot.lane.b32.xlu1 %v1655_v36, %s2971_s21  ;;  %1617 = vrot.lane.b32.xlu0 %v1600_v32, %s2964_s20 }
 0x3f8   : > { %1725 = vrot.lane.b32.xlu1 %v1600_v32, %s2974_s28  ;;  %1667 = vrot.lane.b32.xlu0 %v1646_v39, %s2971_s21  ;;  %v500_v32 = vadd.f32 %v3554_v31, %v3551_v29 }
 0x3fc   : > { %1729 = vrot.lane.b32.xlu1 %v2677_v30, %s2974_s28  ;;  %1723 = vrot.lane.b32.xlu0 %v1549_v33, %s2974_s28 }
 0x400   : > { %1611 = vrot.lane.b32.xlu1 %v1655_v36, %s2964_s20  ;;  %1784 = vrot.lane.b32.xlu0 %v1549_v33, %s2970_s17 }
 0x404   : > { %1615 = vrot.lane.b32.xlu1 %v1602_v40, %s2964_s20  ;;  %1558 = vrot.lane.b32.xlu0 %v1646_v39, %s2973_s30 }
 0x408   : > { %1619 = vrot.lane.b32.xlu1 %v1610_v43, %s2964_s20  ;;  %1778 = vrot.lane.b32.xlu0 %v1646_v39, %s2970_s17  ;;  %v3563_v39 = vld [vmem:[%s3169_s24 + $0x30] sm:$0xff]  ;;  %s4089_s24 = smov 16  }
 0x409   : > { %v506_v30 = vadd.f32 %v3563_v39, %v3560_v38 }
 0x40c   : > { %1842 = vrot.lane.b32.xlu1 %v1833_v28, %s4030_s25  ;;  %1560 = vrot.lane.b32.xlu0 %v1548_v26, %s2973_s30 }
 0x410   : > { %1944 = vrot.lane.b32.xlu1 %v1926_v49, %s2958_s22  ;;  %1727 = vrot.lane.b32.xlu0 %v1511_v35, %s2974_s28 }
 0x414   : > { %1566 = vrot.lane.b32.xlu1 %v1557_v51, %s2973_s30  ;;  %1780 = vrot.lane.b32.xlu0 %v1548_v26, %s2970_s17  ;;  %s4092_s30 = smov 96  }
 0x418   : > { %1786 = vrot.lane.b32.xlu1 %v1776_v54, %s2970_s17  ;;  %1836 = vrot.lane.b32.xlu0 %v1926_v49, %s4030_s25 }
 0x41c   : > { %1892 = vrot.lane.b32.xlu1 %v1878_v56, %s4048_s29  ;;  %1894 = vrot.lane.b32.xlu0 %v1926_v49, %s4048_s29 }
 0x420   : > { %1834 = vrot.lane.b32.xlu1 %v1878_v56, %s4030_s25  ;;  %1665 = vrot.lane.b32.xlu0 %v1654_v57, %s2971_s21 }
 0x424   : > { %1948 = vrot.lane.b32.xlu1 %v1933_v61, %s2958_s22  ;;  %1840 = vrot.lane.b32.xlu0 %v1933_v61, %s4030_s25 }
 0x428   : > { %1673 = vrot.lane.b32.xlu1 %v1664_v63, %s2971_s21  ;;  %1890 = vrot.lane.b32.xlu0 %v1869_v0, %s4048_s29 }
 0x42c   : > { %1838 = vrot.lane.b32.xlu1 %v1825_v5, %s4030_s25  ;;  %1946 = vrot.lane.b32.xlu0 %v1934_v4, %s2958_s22  ;;  %s4088_s25 = smov 40  }
 0x430   : > { %1896 = vrot.lane.b32.xlu1 %v1887_v44, %s4048_s29  ;;  %1888 = vrot.lane.b32.xlu0 %v1877_v8, %s4048_s29 }
 0x434   : > { %1952 = vrot.lane.b32.xlu1 %v2679_v10, %s2958_s22  ;;  %1950 = vrot.lane.b32.xlu0 %v1935_v9, %s2958_s22 }
 0x438   : > { %1731 = vrot.lane.b32.xlu1 %v1720_v11, %s2974_s28  ;;  %1675 = vrot.lane.b32.xlu0 %v1663_v59, %s2971_s21 }
 0x43c   : > { %1898 = vrot.lane.b32.xlu1 %v1886_v6, %s4048_s29  ;;  %1788 = vrot.lane.b32.xlu0 %v1777_v12, %s2970_s17  ;;  %s4091_s29 = smov 8  }
 0x440   : > { %2000 = vperm.xlu1 %2797, %v1997_v13   ;;  %1954 = vrot.lane.b32.xlu0 %v1943_v48, %s2958_s22 }
 0x45a   : > { %v1614_v14 = vpop.permute.xlu0 %1613  ;;  %v1563_v15 = vpop.permute.xlu1 %1562 }
 0x45e   : > { %v3538_v21 = vpop.permute.xlu0 %1671  ;;  %v3540_v23 = vpop.permute.xlu1 %1782 }
 0x45f   : > { %498 = vadd.xlane.f32.xlu0 %v497_v42 }
 0x462   : > { %v1722_v33 = vpop.permute.xlu1 %1721  ;;  %v1565_v35 = vpop.permute.xlu0 %1564 }
 0x463   : > { %v1570_v36 = vsel %vm817_vm9, %v1563_v15, %v1565_v35  ;;  %504 = vadd.xlane.f32.xlu0 %v503_v27 }
 0x464   : > { %1579 = vst [vmem:[#allocation3 + $0x10] sm:$0xc] %v1570_v36  ;;  %501 = vadd.xlane.f32.xlu1 %v500_v32 }
 0x466   : > { %v1670_v40 = vpop.permute.xlu1 %1669  ;;  %v1618_v43 = vpop.permute.xlu0 %1617 }
 0x467   : > { %v1679_v1 = vsel %vm586_vm5, %v1670_v40, %v3538_v21  ;;  %507 = vadd.xlane.f32.xlu0 %v506_v30 }
 0x468   : > { %1689 = vst [vmem:[#allocation3 + $0x10] sm:$0xc0] %v1679_v1 }
 0x46a   : > { %v1726_v28 = vpop.permute.xlu1 %1725  ;;  %v1668_v26 = vpop.permute.xlu0 %1667 }
 0x46b   : > { %v1678_v45 = vsel %vm586_vm5, %v1668_v26, %v1670_v40 }
 0x46c   : > { %1688 = vst [vmem:[#allocation3 + $0x8] sm:$0xc0] %v1678_v45 }
 0x46e   : > { %v3570_v49 = vpop.permute.xlu1 %1729  ;;  %v1724_v50 = vpop.permute.xlu0 %1723 }
 0x46f   : > { %v1733_v51 = vsel %vm987_vm7, %v1722_v33, %v1724_v50  ;;  %v1734_v53 = vsel %vm987_vm7, %v1724_v50, %v1726_v28 }
 0x470   : > { %1743 = vst [vmem:[#allocation3 + $0x28] sm:$0x3] %v1733_v51  ;;  %1744 = vst [vmem:[#allocation3 + $0x30] sm:$0x3] %v1734_v53 }
 0x472   : > { %v1612_v54 = vpop.permute.xlu1 %1611  ;;  %v1785_v56 = vpop.permute.xlu0 %1784 }
 0x473   : > { %v1621_v57 = vsel %vm872_vm4, %v1612_v54, %v1614_v14  ;;  %v1792_v58 = vsel %vm4053_vm1, %v3540_v23, %v1785_v56  ;;  %vm4062_vm1 = vmmov %vm4061_vm13 }
 0x474   : > { %1630 = vst [vmem:[#allocation3] sm:$0x30] %v1621_v57  ;;  %1802 = vst [vmem:[#allocation3 + $0x38] sm:$0xc] %v1792_v58 }
 0x476   : > { %v1616_v60 = vpop.permute.xlu1 %1615  ;;  %v1559_v61 = vpop.permute.xlu0 %1558 }
 0x477   : > { %v1622_v59 = vsel %vm872_vm4, %v1614_v14, %v1616_v60  ;;  %v1623_v62 = vsel %vm872_vm4, %v1616_v60, %v1618_v43 }
 0x478   : > { %1631 = vst [vmem:[#allocation3 + $0x8] sm:$0x30] %v1622_v59  ;;  %1632 = vst [vmem:[#allocation3 + $0x10] sm:$0x30] %v1623_v62 }
 0x47a   : > { %v1620_v63 = vpop.permute.xlu1 %1619  ;;  %v1779_v0 = vpop.permute.xlu0 %1778 }
 0x47b   : > { %v1624_v4 = vsel %vm872_vm4, %v1618_v43, %v1620_v63  ;;  %1634 = vst.msk [vmem:[#allocation3 + $0x20] sm:$0x30] %vm4054_vm6, %v1620_v63  ;;  %vm4056_vm4 = vcmask 519170  }
 0x47c   : > { %1633 = vst [vmem:[#allocation3 + $0x18] sm:$0x30] %v1624_v4 }
 0x47d   : > { %2200 = vperm.xlu0 %2796, %v2197_v3  }
 0x47e   : > { %v1843_v5 = vpop.permute.xlu1 %1842  ;;  %v1561_v6 = vpop.permute.xlu0 %1560 }
 0x47f   : > { %1857 = vst.msk [vmem:[#allocation3 + $0x48] sm:$0x30] %vm4055_vm3, %v1843_v5  ;;  %v1568_v8 = vsel %vm817_vm9, %v1559_v61, %v1561_v6  ;;  %v1569_v44 = vsel %vm817_vm9, %v1561_v6, %v1563_v15  ;;  %vm4064_vm3 = vmmov %vm4062_vm1 }
 0x480   : > { %1577 = vst [vmem:[#allocation3] sm:$0xc] %v1568_v8  ;;  %1578 = vst [vmem:[#allocation3 + $0x8] sm:$0xc] %v1569_v44 }
 0x482   : > { %v1945_v9 = vpop.permute.xlu1 %1944  ;;  %v1728_v10 = vpop.permute.xlu0 %1727 }
 0x483   : > { %v1735_v11 = vsel %vm987_vm7, %v1726_v28, %v1728_v10  ;;  %v1736_v12 = vsel %vm987_vm7, %v1728_v10, %v3570_v49 }
 0x484   : > { %1745 = vst [vmem:[#allocation3 + $0x38] sm:$0x3] %v1735_v11  ;;  %1746 = vst [vmem:[#allocation3 + $0x40] sm:$0x3] %v1736_v12 }
 0x486   : > { %v1567_v13 = vpop.permute.xlu1 %1566  ;;  %v1781_v48 = vpop.permute.xlu0 %1780 }
 0x487   : > { %v1571_v14 = vsel %vm817_vm9, %v1565_v35, %v1567_v13  ;;  %1581 = vst.msk [vmem:[#allocation3 + $0x20] sm:$0xc] %vm4056_vm4, %v1567_v13  ;;  %v1790_v42 = vsel %vm4057_vm8, %v1779_v0, %v1781_v48  ;;  %v1791_v15 = vsel %vm4058_vm11, %v1781_v48, %v3540_v23  ;;  %vm4060_vm9 = vcmask 490496   ;;  %vm4065_vm4 = vmmov %vm4062_vm1  ;;  %v1973_v8 = vld [vmem:[#allocation3 + $0x8] sm:$0xff] }
 0x488   : > { %1580 = vst [vmem:[#allocation3 + $0x18] sm:$0xc] %v1571_v14  ;;  %1800 = vst [vmem:[#allocation3 + $0x28] sm:$0xc] %v1790_v42  ;;  %vm4066_vm8 = vcmask 457728  }
 0x489   : > { %1801 = vst [vmem:[#allocation3 + $0x30] sm:$0xc] %v1791_v15  ;;  %vm4063_vm6 = vmmov %vm4060_vm9 }
 0x48a   : > { %v3595_v27 = vpop.permute.xlu1 %1786  ;;  %v1837_v32 = vpop.permute.xlu0 %1836  ;;  %vm4067_vm11 = vmmov %vm4066_vm8 }
 0x48b   : > { %v1793_v33 = vsel %vm4059_vm12, %v1785_v56, %v3595_v27  ;;  %vm4068_vm12 = vmmov %vm4063_vm6 }
 0x48c   : > { %1803 = vst [vmem:[#allocation3 + $0x40] sm:$0xc] %v1793_v33 }
 0x48e   : > { %v1893_v36 = vpop.permute.xlu1 %1892  ;;  %v1895_v30 = vpop.permute.xlu0 %1894 }
 0x48f   : > { %v1902_v35 = vsel %vm4060_vm9, %v1893_v36, %v1895_v30  ;;  %vm4069_vm9 = vmmov %vm4063_vm6 }
 0x490   : > { %1912 = vst [vmem:[#allocation3 + $0x38] sm:$0xc0] %v1902_v35 }
 0x492   : > { %v1835_v40 = vpop.permute.xlu1 %1834  ;;  %v1666_v43 = vpop.permute.xlu0 %1665 }
 0x493   : > { %v1844_v1 = vsel %vm4061_vm13, %v1835_v40, %v1837_v32  ;;  %v1677_v23 = vsel %vm586_vm5, %v1666_v43, %v1668_v26  ;;  %vm4070_vm13 = vmmov %vm4066_vm8  ;;  %v1974_v40 = vld [vmem:[#allocation3 + $0x10] sm:$0xff] }
 0x494   : > { %1853 = vst [vmem:[#allocation3 + $0x28] sm:$0x30] %v1844_v1  ;;  %1687 = vst [vmem:[#allocation3] sm:$0xc0] %v1677_v23 }
 0x496   : > { %v1949_v28 = vpop.permute.xlu1 %1948  ;;  %v1841_v45 = vpop.permute.xlu0 %1840 }
 0x497   : > { %v1847_v50 = vsel %vm4062_vm1, %v1841_v45, %v1843_v5  ;;  %vm4071_vm1 = vmmov %vm4066_vm8 }
 0x498   : > { %1856 = vst [vmem:[#allocation3 + $0x40] sm:$0x30] %v1847_v50 }
 0x49a   : > { %v1674_v51 = vpop.permute.xlu1 %1673  ;;  %v1891_v53 = vpop.permute.xlu0 %1890 }
 0x49b   : > { %v1680_v54 = vsel %vm586_vm5, %v3538_v21, %v1674_v51  ;;  %v1901_v56 = vsel %vm4063_vm6, %v1891_v53, %v1893_v36  ;;  %v1972_v10 = vld [vmem:[#allocation3] sm:$0xff]  ;;  %vm4072_vm6 = vcmask 523270  }
 0x49c   : > { %1690 = vst [vmem:[#allocation3 + $0x18] sm:$0xc0] %v1680_v54  ;;  %1911 = vst [vmem:[#allocation3 + $0x30] sm:$0xc0] %v1901_v56 }
 0x49e   : > { %v1839_v57 = vpop.permute.xlu1 %1838  ;;  %v1947_v58 = vpop.permute.xlu0 %1946 }
 0x49f   : > { %v1845_v26 = vsel %vm4064_vm3, %v1837_v32, %v1839_v57  ;;  %v1846_v60 = vsel %vm4065_vm4, %v1839_v57, %v1841_v45  ;;  %v1956_v61 = vsel %vm4066_vm8, %v1945_v9, %v1947_v58  ;;  %v1957_v59 = vsel %vm4067_vm11, %v1947_v58, %v1949_v28  ;;  %vm4076_vm4 = vmmov %vm4072_vm6 }
 0x4a0   : > { %1854 = vst [vmem:[#allocation3 + $0x30] sm:$0x30] %v1845_v26  ;;  %1855 = vst [vmem:[#allocation3 + $0x38] sm:$0x30] %v1846_v60  ;;  %vm4075_vm3 = vcmask 1040384   ;;  %vm4077_vm8 = vcmask 519170  }
 0x4a1   : > { %1966 = vst [vmem:[#allocation3 + $0x50] sm:$0x3] %v1956_v61  ;;  %1967 = vst [vmem:[#allocation3 + $0x58] sm:$0x3] %v1957_v59 }
 0x4a2   : > { %v1897_v62 = vpop.permute.xlu1 %1896  ;;  %v1889_v21 = vpop.permute.xlu0 %1888  ;;  %vm4078_vm11 = vmmov %vm4075_vm3 }
 0x4a3   : > { %v1903_v63 = vsel %vm4068_vm12, %v1895_v30, %v1897_v62  ;;  %v1900_v0 = vsel %vm4069_vm9, %v1889_v21, %v1891_v53  ;;  %v1975_v33 = vld [vmem:[#allocation3 + $0x18] sm:$0xff]  ;;  %vm4079_vm12 = vmmov %vm4075_vm3 }
 0x4a4   : > { %1913 = vst [vmem:[#allocation3 + $0x40] sm:$0xc0] %v1903_v63  ;;  %1910 = vst [vmem:[#allocation3 + $0x28] sm:$0xc0] %v1900_v0 }
 0x4a6   : > { %v1953_v3 = vpop.permute.xlu1 %1952  ;;  %v1951_v4 = vpop.permute.xlu0 %1950 }
 0x4a7   : > { %v1958_v5 = vsel %vm4070_vm13, %v1949_v28, %v1951_v4  ;;  %v1959_v6 = vsel %vm4071_vm1, %v1951_v4, %v1953_v3  ;;  %v1978_v44 = vld [vmem:[#allocation3 + $0x30] sm:$0xff]  ;;  %v1979_v48 = vld [vmem:[#allocation3 + $0x38] sm:$0xff]  ;;  %vm4081_vm13 = vmmov %vm4071_vm1  ;;  %vm4082_vm1 = vcmask 146432  }
 0x4a8   : > { %1968 = vst [vmem:[#allocation3 + $0x60] sm:$0x3] %v1958_v5  ;;  %1969 = vst [vmem:[#allocation3 + $0x68] sm:$0x3] %v1959_v6  ;;  %v1988_v9 = vpack.c.bf16 %v1978_v44, %v1973_v8  ;;  %v1983_v13 = vld [vmem:[#allocation3 + $0x58] sm:$0x3]  ;;  %v1989_v1 = vpack.c.bf16 %v1979_v48, %v1974_v40 }
 0x4a9   : > { %v1982_v14 = vld [vmem:[#allocation3 + $0x50] sm:$0x3]  ;;  %v1993_v43 = vpack.c.bf16 %v1983_v13, %v1983_v13  ;;  %v514_v5 = vld [vmem:[%s3988_s2] sm:$0xff] }
 0x4aa   : > { %v1732_v11 = vpop.permute.xlu1 %1731  ;;  %v1676_v12 = vpop.permute.xlu0 %1675  ;;  %2021 = vmatprep.subr.bf16.mxu0 %v1988_v9  ;;  %v1992_v23 = vpack.c.bf16 %v1982_v14, %v1982_v14  ;;  %v517_v14 = vld [vmem:[%s3988_s2 + $0x18] sm:$0xff] }
 0x4ab   : > { %v1737_v42 = vsel %vm987_vm7, %v3570_v49, %v1732_v11  ;;  %v1681_v15 = vsel %vm586_vm5, %v1674_v51, %v1676_v12  ;;  %v1977_v32 = vld [vmem:[#allocation3 + $0x28] sm:$0xff]  ;;  %v1980_v36 = vld [vmem:[#allocation3 + $0x40] sm:$0xff]  ;;  %vm4073_vm7 = vmmov %vm4069_vm9  ;;  %vm4074_vm5 = vcmask 195584  }
 0x4ac   : > { %1747 = vst.msk [vmem:[#allocation3 + $0x48] sm:$0x3] %vm776_vm14, %v1737_v42  ;;  %v1987_v30 = vpack.c.bf16 %v1977_v32, %v1972_v10  ;;  %v1990_v35 = vpack.c.bf16 %v1980_v36, %v1975_v33  ;;  %v2007_v57 = vsel %vm4078_vm11, %v1992_v23, 0  ;;  %vm4080_vm9 = vmmov %vm4075_vm3  ;;  %v515_v10 = vld [vmem:[%s3988_s2 + $0x8] sm:$0xff]  ;;  %vm3781_vm11 = vcmp.ge.s32.totalorder %v543_v19, 48 }
 0x4ad   : > { %1691 = vst.msk [vmem:[#allocation3 + $0x20] sm:$0xc0] %vm4072_vm6, %v1681_v15  ;;  %vm4083_vm6 = vmmov %vm4082_vm1 }
 0x4ae   : > { %v1899_v28 = vpop.permute.xlu1 %1898  ;;  %v1789_v45 = vpop.permute.xlu0 %1788  ;;  %2022 = vmatpush1.bf16.msra.mxu0 %v1987_v30  ;;  %2062 = vmatprep.subr.bf16.mxu1 %v1990_v35 }
 0x4af   : > { %v1904_v49 = vsel %vm4073_vm7, %v1897_v62, %v1899_v28  ;;  %v1794_v50 = vsel %vm4074_vm5, %v3595_v27, %v1789_v45  ;;  %2680 = vmatprep.subr.msk.bf16.mxu0 %vm4075_vm3, %v1993_v43  ;;  %2063 = vmatpush1.bf16.msra.mxu1 %v1989_v1  ;;  %v1985_v51 = vld [vmem:[#allocation3 + $0x68] sm:$0x3]  ;;  %v1984_v53 = vld [vmem:[#allocation3 + $0x60] sm:$0x3]  ;;  %v1971_v27 = vld [vmem:[%s3996_s10] sm:$0x1] }
 0x4b0   : > { %1914 = vst.msk [vmem:[#allocation3 + $0x48] sm:$0xc0] %vm4076_vm4, %v1904_v49  ;;  %v1995_v54 = vpack.c.bf16 %v1985_v51, %v1985_v51  ;;  %v1994_v56 = vpack.c.bf16 %v1984_v53, %v1984_v53  ;;  %vm4084_vm7 = vmmov 0   ;;  %vm4085_vm5 = vmmov %vm4075_vm3  ;;  %v536_v51 = vld [vmem:[%s3989_s3] sm:$0x1]  ;;  %vm3771_vm4 = vcmp.ge.s32.totalorder %v543_v19, 32 }
 0x4b1   : > { %1804 = vst.msk [vmem:[#allocation3 + $0x48] sm:$0xc] %vm4077_vm8, %v1794_v50  ;;  %vm4086_vm3 = vmmov %vm4082_vm1  ;;  %vm3776_vm8 = vcmp.lt.s32.totalorder %v543_v19, 48 }
 0x4b2   : > { %v1955_v58 = vpop.permute.xlu0 %1954  ;;  %2024 = vmatpush1.bf16.msra.mxu0 %v2007_v57  ;;  %2682 = vmatprep.subr.msk.bf16.mxu1 %vm4079_vm12, %v1995_v54  ;;  %v2013_v26 = vsel %vm4080_vm9, %v1994_v56, 0  ;;  %v539_v57 = vld [vmem:[%s3990_s4] sm:$0xff]  ;;  %vm3786_vm12 = vcmp.lt.s32.totalorder %v543_v19, 64  ;;  %vm2337_vm9 = vcmask 326656  }
 0x4b3   : > { %v1960_v60 = vsel %vm4081_vm13, %v1953_v3, %v1955_v58  ;;  %2065 = vmatpush1.bf16.msra.mxu1 %v2013_v26  ;;  %2714 = vmatprep.subr.bf16.mxu0 %v2955_v2  ;;  %vm3791_vm13 = vcmp.ge.s32.totalorder %v543_v19, 64 }
 0x4b4   : > { %1970 = vst.msk [vmem:[#allocation3 + $0x70] sm:$0x3] %vm776_vm14, %v1960_v60  ;;  %v1976_v61 = vld [vmem:[#allocation3 + $0x20] sm:$0xff]  ;;  %vm522_vm14 = vcmask 15360  }
 0x4b5   : > { %2681 = vmatmul.mubr.msk.bf16.vlgmr.msra.gmra.mrb[8].mxu0 %vm4082_vm1, %v1971_v27  ;;  %v541_v60 = vld [vmem:[%s3990_s4 + $0x10] sm:$0xff]  ;;  %vm3796_vm1 = vcmp.lt.s32.totalorder %v543_v19, 80 }
 0x4b6   : > { %2683 = vmatmul.mubr.msk.bf16.vlgmr.msra.gmra.mrb[8].mxu1 %vm4083_vm6, %v1971_v27  ;;  %2718 = vmatprep.mubr.msk.bf16.mxu0 %vm4084_vm7, %v2955_v2  ;;  %vm4031_vm6 = vmand %vm3771_vm4, %vm3776_vm8 }
 0x4b7   : > { %vm4032_vm7 = vmand %vm3781_vm11, %vm3786_vm12 }
 0x4b8   : > { %v1981_v59 = vld [vmem:[#allocation3 + $0x48] sm:$0xff] }
 0x4b9   : > { %v1991_v62 = vpack.c.bf16 %v1981_v59, %v1976_v61  ;;  %v542_v59 = vld [vmem:[%s3990_s4 + $0x18] sm:$0xff] }
 0x4bb   : > { %2715 = vmatpush3.bf16.msra.mxu0 %v1991_v62  ;;  %v1986_v21 = vld [vmem:[#allocation3 + $0x70] sm:$0x3] }
 0x4bc   : > { %2716 = vmatprep.subr.bf16.mxu0 %v2955_v2  ;;  %v1996_v63 = vpack.c.bf16 %v1986_v21, %v1986_v21  ;;  %v516_v2 = vld [vmem:[%s3988_s2 + $0x10] sm:$0xff] }
 0x4be   : > { %v2019_v0 = vsel %vm4085_vm5, %v1996_v63, 0  ;;  %vm4033_vm5 = vmand %vm3791_vm13, %vm3796_vm1 }
 0x4bf   : > { %2717 = vmatpush3.bf16.msra.mxu0 %v2019_v0  ;;  %v3641_v4 = vpop.permute.xlu1 %2000  ;;  %v540_v0 = vld [vmem:[%s3990_s4 + $0x8] sm:$0xff] }
 0x4c2   : > { %2719 = vmatmul.mubr.msk.bf16.vlgmr.msra.gmra.mrb[12].mxu0 %vm4086_vm3, %v1971_v27  ;;  %vm3813_vm3 = vcmp.ge.s32.totalorder %v543_v19, 80 }
 0x4ec   : > { %v499_v3 = vpop.xlane.xlu0 %498 }
 0x4ed   : > { %v510_v6 = vmul.f32 0.00390625, %v499_v3 }
 0x4ef   : > { %v518_v8 = vmul.f32 %v514_v5, %v510_v6 }
 0x4f0   : > { %v505_v44 = vpop.xlane.xlu0 %504 }
 0x4f1   : > { %v512_v9 = vmul.f32 0.00390625, %v505_v44  ;;  %v502_v11 = vpop.xlane.xlu1 %501  ;;  %v523_v48 = vsel %vm522_vm14, %v518_v8, 0.0 }
 0x4f2   : > { %v511_v12 = vmul.f32 0.00390625, %v502_v11 }
 0x4f3   : > { %v520_v13 = vmul.f32 %v516_v2, %v512_v9 }
 0x4f4   : > { %v508_v42 = vpop.xlane.xlu0 %507  ;;  %v519_v15 = vmul.f32 %v515_v10, %v511_v12 }
 0x4f5   : > { %v513_v32 = vmul.f32 0.00390625, %v508_v42  ;;  %v526_v33 = vsel %vm522_vm14, %v520_v13, 0.0 }
 0x4f6   : > { %v524_v36 = vsel %vm522_vm14, %v519_v15, 0.0 }
 0x4f7   : > { %v521_v30 = vmul.f32 %v517_v14, %v513_v32  ;;  %v525_v35 = vadd.f32 %v524_v36, %v523_v48 }
 0x4f9   : > { %v528_v40 = vsel %vm522_vm14, %v521_v30, 0.0  ;;  %v527_v43 = vadd.f32 %v526_v33, %v525_v35 }
 0x4fb   : > { %v529_v1 = vadd.f32 %v528_v40, %v527_v43 }
 0x4fd   : > { %v530_v23 = vrot.slane %v529_v1, 4 }
 0x4ff   : > { %v531_v28 = vadd.f32 %v530_v23, %v529_v1 }
 0x501   : > { %v532_v45 = vrot.slane %v531_v28, 2 }
 0x503   : > { %v533_v49 = vadd.f32 %v532_v45, %v531_v28 }
 0x505   : > { %v534_v50 = vrot.slane %v533_v49, 1 }
 0x507   : > { %v535_v53 = vadd.f32 %v534_v50, %v533_v49 }
 0x509   : > { %v537_v54 = vadd.f32 %v536_v51, %v535_v53 }
 0x50b   : > { %v538_v56 = vmax.f32 %v537_v54, 0.0 }
 0x50d   : > { %v546_v58 = vrot.slane %v538_v56, %v3422_v34  ;;  %v2270_v56 = vld [vmem:[#allocation5] sm:$0x1] }
 0x50f   : > { %v547_v26 = vmul.f32 %v546_v58, %v539_v57  ;;  %v549_v61 = vmul.f32 %v546_v58, %v541_v60  ;;  %v550_v21 = vmul.f32 %v546_v58, %v542_v59  ;;  %v548_v3 = vmul.f32 %v546_v58, %v540_v0  ;;  %v2201_v57 = vpop.permute.xlu0 %2200 }
 0x510   : > { %v2977_v60 = vmov 269488144  }
 0x511   : > { %v551_v27 = vsel %vm522_vm14, %v547_v26, 0.0  ;;  %v557_v62 = vsel %vm522_vm14, %v549_v61, 0.0  ;;  %v560_v63 = vsel %vm522_vm14, %v550_v21, 0.0  ;;  %v554_v5 = vsel %vm522_vm14, %v548_v3, 0.0 }
 0x512   : > { %552 = vadd.xlane.f32.xlu0 %v551_v27  ;;  %v2203_v61 = vunpack.c.l.s4 %v2977_v60  ;;  %vm3818_vm14 = vcmp.lt.s32.totalorder %v543_v19, 96 }
 0x516   : > { %558 = vadd.xlane.f32.xlu0 %v557_v62  ;;  %v2204_v62 = vunpack.c.0.s8 %v2203_v61 }
 0x51a   : > { %561 = vadd.xlane.f32.xlu0 %v560_v63  ;;  %v2207_v63 = vsub.s32 %v2204_v62, %v3201_v20 }
 0x588   : > { %v2055_v6 = vpop.f32.mrb[8].mxu0 }
 0x589   : > { %v2056_v8 = vadd.f32 %v2055_v6, %v3641_v4  ;;  %v2057_v2 = vpop.f32.mrb[9].mxu0  ;;  %v2096_v44 = vpop.f32.mrb[8].mxu1 }
 0x58a   : > { %v2058_v9 = vadd.f32 %v2057_v2, %v3641_v4  ;;  %v2097_v10 = vadd.f32 %v2096_v44, %v3641_v4  ;;  %v2098_v11 = vpop.f32.mrb[9].mxu1  ;;  %v2059_v12 = vpop.f32.mrb[10].mxu0 }
 0x58b   : > { %v2143_v13 = vmax.f32 %v2056_v8, 0.0  ;;  %v2099_v48 = vadd.f32 %v2098_v11, %v3641_v4  ;;  %v2100_v14 = vpop.f32.mrb[10].mxu1  ;;  %v2060_v42 = vpop.f32.mrb[11].mxu0 }
 0x58c   : > { %v2144_v15 = vmax.f32 %v2058_v9, 0.0  ;;  %v2145_v32 = vmax.f32 %v2097_v10, 0.0  ;;  %v2101_v33 = vpop.f32.mrb[11].mxu1 }
 0x58d   : > { %v2148_v36 = vmul.f32 %v2143_v13, %v3431_v46  ;;  %v2146_v30 = vmax.f32 %v2099_v48, 0.0 }
 0x58e   : > { %v2149_v35 = vmul.f32 %v2144_v15, %v3435_v47  ;;  %v2150_v40 = vmul.f32 %v2145_v32, %v3437_v52 }
 0x58f   : > { %v2151_v43 = vmul.f32 %v2146_v30, %v3439_v55 }
 0x590   : > { %v2158_v1 = vcombine.low %v2148_v36, %v2149_v35 }
 0x591   : > { %v2159_v23 = vcombine.low %v2150_v40, %v2151_v43  ;;  %v2978_v40 = vmov 1966171168  }
 0x592   : > { %v2166_v28 = vrot.slane %v2158_v1, %v3204_v24  ;;  %v2290_v43 = vunpack.c.l.s4 %v2978_v40 }
 0x593   : > { %v2173_v45 = vrot.slane %v2159_v23, %v3204_v24 }
 0x595   : > { %v2137_v49 = vpop.f32.mrb[12].mxu0  ;;  %v2174_v50 = vcombine.low %v2166_v28, %v2173_v45 }
 0x596   : > { %v2138_v51 = vadd.f32 %v2137_v49, %v3641_v4  ;;  %v2720_v53 = vpop.f32.mrb[13].mxu0  ;;  %v563_v4 = vld [vmem:[%s3991_s5] sm:$0xff] }
 0x597   : > { %v2140_v54 = vpop.f32.mrb[14].mxu0  ;;  %2182 = vrot.lane.b32.xlu1 %v2174_v50, %s2976_s15 }
 0x598   : > { %v2147_v46 = vmax.f32 %v2138_v51, 0.0  ;;  %v2721_v47 = vpop.f32.mrb[15].mxu0 }
 0x59a   : > { %v2152_v52 = vmul.f32 %v2147_v46, %v3446_v7  ;;  %v2291_v46 = vunpack.c.0.s8 %v2290_v43  ;;  %v566_v43 = vld [vmem:[%s3991_s5 + $0x18] sm:$0xff] }
 0x59c   : > { %v2181_v55 = vrot.slane %v2152_v52, %v3204_v24 }
 0x59e   : > { %2184 = vrot.lane.b32.xlu1 %v2181_v55, %s2976_s15  ;;  %s4087_s15 = smov 48  }
 0x59f   : > { %v553_v58 = vpop.xlane.xlu0 %552 }
 0x5a0   : > { %v567_v26 = vadd.f32 %v563_v4, %v553_v58 }
 0x5a2   : > { %2273 = vperm.xlu1 %2797, %v2270_v56   ;;  %v571_v27 = vmax.f32 %v567_v26, 0.0  ;;  %v2294_v26 = vsub.s32 %v2291_v46, %v3201_v20 }
 0x5c6   : > { %555 = vadd.xlane.f32.xlu1 %v554_v5  ;;  %v2208_v5 = vrot.slane %v2201_v57, %v2207_v63 }
 0x5d7   : > { %2455 = vperm.xlu1 %2797, %v571_v27  }
 0x609   : > { %v2183_v59 = vpop.permute.xlu1 %2182 }
 0x60a   : > { %v2186_v7 = vrot.slane %v2183_v59, 6 }
 0x60c   : > { %v2188_v21 = vsel %vm1475_vm2, %v2186_v7, %v2183_v59 }
 0x60d   : > { %2193 = vst.msk [vmem:[#allocation2] sm:$0xff] %vm3455_vm15, %v2188_v21  ;;  %vm3750_vm15 = vcmp.lt.s32.totalorder %v543_v19, 32 }
 0x610   : > { %v2185_v0 = vpop.permute.xlu1 %2184 }
 0x611   : > { %v2187_v3 = vrot.slane %v2185_v0, 6 }
 0x613   : > { %v2189_v6 = vsel %vm634_vm0, %v2186_v7, %v2187_v3 }
 0x614   : > { %v2190_v8 = vsel %vm1475_vm2, %v2189_v6, %v2185_v0  ;;  %v2195_v2 = vld [vmem:[#allocation2] sm:$0xff]  ;;  %vm3755_vm2 = vcmp.lt.s32.totalorder %v543_v19, 16 }
 0x615   : > { %2194 = vst.msk [vmem:[#allocation2 + $0x8] sm:$0xf] %vm3461_vm10, %v2190_v8  ;;  %v2210_v44 = vmul.f32 %v2208_v5, %v2195_v2 }
 0x617   : > { %v2214_v9 = vcombine.high %v2210_v44, %v2210_v44  ;;  %v2221_v10 = vrot.slane %v2210_v44, %v3204_v24 }
 0x619   : > { %v2228_v16 = vrot.slane %v2214_v9, %v3204_v24  ;;  %v2229_v11 = vcombine.high %v2221_v10, %v2221_v10 }
 0x61b   : > { %v2230_v12 = vcombine.high %v2228_v16, %v2228_v16  ;;  %v2242_v13 = vsel %vm634_vm0, %v2229_v11, 0.0  ;;  %v2249_v48 = vsel %vm634_vm0, %v2228_v16, 0.0 }
 0x61c   : > { %v2196_v14 = vld [vmem:[#allocation2 + $0x8] sm:$0xf]  ;;  %v2243_v42 = vrot.slane %v2242_v13, 4  ;;  %v2250_v15 = vrot.slane %v2249_v48, 4 }
 0x61d   : > { %v2211_v32 = vmul.f32 %v2208_v5, %v2196_v14  ;;  %v2256_v33 = vsel %vm634_vm0, %v2230_v12, 0.0 }
 0x61e   : > { %v2244_v22 = vadd.f32 %v2243_v42, %v2242_v13  ;;  %v2251_v36 = vadd.f32 %v2250_v15, %v2249_v48  ;;  %v2257_v30 = vrot.slane %v2256_v33, 4  ;;  %v565_v15 = vld [vmem:[%s3991_s5 + $0x10] sm:$0xff] }
 0x61f   : > { %v2237_v35 = vrot.slane %v2211_v32, %v3204_v24  ;;  %v559_v32 = vpop.xlane.xlu0 %558 }
 0x620   : > { %v2245_v1 = vrot.slane %v2244_v22, 2  ;;  %v2252_v23 = vrot.slane %v2251_v36, 2  ;;  %v2258_v28 = vadd.f32 %v2257_v30, %v2256_v33  ;;  %v569_v33 = vadd.f32 %v565_v15, %v559_v32 }
 0x621   : > { %v2263_v45 = vsel %vm634_vm0, %v2237_v35, 0.0  ;;  %v2274_v54 = vpop.permute.xlu1 %2273  ;;  %vm3745_vm0 = vcmp.ge.s32.totalorder %v543_v19, 16 }
 0x622   : > { %v2246_v49 = vadd.f32 %v2245_v1, %v2244_v22  ;;  %v2253_v50 = vadd.f32 %v2252_v23, %v2251_v36  ;;  %v2259_v51 = vrot.slane %v2258_v28, 2  ;;  %v2264_v53 = vrot.slane %v2263_v45, 4  ;;  %v564_v36 = vld [vmem:[%s3991_s5 + $0x8] sm:$0xff]  ;;  %vm4034_vm10 = vmand %vm3745_vm0, %vm3750_vm15 }
 0x623   : > { %v2279_v58 = vrot.slane %v2274_v54, %v3422_v34  ;;  %v573_v22 = vmax.f32 %v569_v33, 0.0  ;;  %v562_v1 = vpop.xlane.xlu0 %561 }
 0x624   : > { %v2247_v47 = vrot.slane %v2246_v49, 1  ;;  %v2254_v52 = vrot.slane %v2253_v50, 1  ;;  %v2260_v55 = vadd.f32 %v2259_v51, %v2258_v28  ;;  %v2265_v56 = vadd.f32 %v2264_v53, %v2263_v45 }
 0x625   : > { %v570_v23 = vadd.f32 %v566_v43, %v562_v1 }
 0x626   : > { %v2248_v57 = vadd.f32 %v2247_v47, %v2246_v49  ;;  %v2255_v4 = vadd.f32 %v2254_v52, %v2253_v50  ;;  %v2261_v24 = vrot.slane %v2260_v55, 1  ;;  %v2266_v59 = vrot.slane %v2265_v56, 2 }
 0x627   : > { %v574_v28 = vmax.f32 %v570_v23, 0.0 }
 0x628   : > { %v2262_v27 = vadd.f32 %v2261_v24, %v2260_v55  ;;  %v2280_v60 = vadd.f32 %v2279_v58, %v2248_v57  ;;  %v2281_v61 = vadd.f32 %v2279_v58, %v2255_v4  ;;  %v2267_v3 = vadd.f32 %v2266_v59, %v2265_v56 }
 0x629   : > { %v4114_v24 = vmov 0 }
 0x62a   : > { %v2282_v7 = vadd.f32 %v2279_v58, %v2262_v27  ;;  %v2284_v62 = vmax.f32 %v2280_v60, 0.0  ;;  %v3714_v21 = vmax.f32 %v2281_v61, 0.0  ;;  %v2268_v44 = vrot.slane %v2267_v3, 1 }
 0x62b   : > { %v4115_v24 = vsel %vm3796_vm1, 4294967295, %v4114_v24 }
 0x62c   : > { %v2319_v63 = vcombine.low %v2284_v62, %v3714_v21  ;;  %v2295_v0 = vrot.slane %v2284_v62, %v2294_v26  ;;  %v2286_v5 = vmax.f32 %v2282_v7, 0.0  ;;  %v2350_v8 = vrot.slane %v3714_v21, %v2294_v26 }
 0x62d   : > { %v2269_v11 = vadd.f32 %v2268_v44, %v2267_v3 }
 0x62e   : > { %v2302_v6 = vrot.slane %v2295_v0, %v2294_v26  ;;  %v2326_v2 = vrot.slane %v2319_v63, %v2294_v26  ;;  %v2397_v9 = vrot.slane %v2286_v5, %v2294_v26  ;;  %v2357_v10 = vrot.slane %v2350_v8, %v2294_v26 }
 0x62f   : > { %v2283_v13 = vadd.f32 %v2279_v58, %v2269_v11  ;;  %v4126_v5 = vmov 0 }
 0x630   : > { %2303 = vrot.lane.b32.xlu0 %v2302_v6, %s2958_s22  ;;  %2311 = vrot.lane.b32.xlu1 %v2302_v6, %s4087_s15  ;;  %v2333_v16 = vrot.slane %v2326_v2, %v2294_v26  ;;  %v2404_v12 = vrot.slane %v2397_v9, %v2294_v26  ;;  %s4090_s22 = smov 104   ;;  %s4096_s15 = smov 72  }
 0x631   : > { %v2287_v48 = vmax.f32 %v2283_v13, 0.0 }
 0x633   : > { %v2432_v14 = vrot.slane %v2287_v48, %v2294_v26 }
 0x634   : > { %2358 = vrot.lane.b32.xlu0 %v2357_v10, %s2971_s21  ;;  %2334 = vrot.lane.b32.xlu1 %v2333_v16, %s4088_s25  ;;  %s4093_s21 = smov 112  }
 0x635   : > { %v2439_v42 = vrot.slane %v2432_v14, %v2294_v26 }
 0x638   : > { %2365 = vrot.lane.b32.xlu0 %v2357_v10, %s2970_s17  ;;  %2405 = vrot.lane.b32.xlu1 %v2404_v12, %s2964_s20  ;;  %s4095_s20 = smov 80   ;;  %s2699_s17 = sshll.u32 %s3080_s13, 10 }
 0x639   : > { %s3938_s13 = scalar_lea.hbm %s4000_s14, %s2699_s17 }
 0x63c   : > { %2372 = vrot.lane.b32.xlu0 %v2357_v10, %s4089_s24  ;;  %2413 = vrot.lane.b32.xlu1 %v2404_v12, %s4090_s22  ;;  %s2565_s22 = scalar_lea.sflag [#allocation8], %s3163_s19 }
 0x640   : > { %2379 = vrot.lane.b32.xlu0 %v2357_v10, %s4091_s29  ;;  %2417 = vrot.lane.b32.xlu1 %v2404_v12, %s4092_s30  ;;  %s2979_s30 = smov [#allocation9]  }
 0x644   : > { %2409 = vrot.lane.b32.xlu0 %v2404_v12, %s4093_s21  ;;  %2421 = vrot.lane.b32.xlu1 %v2404_v12, %s4094_s23  ;;  %s4097_s21 = smov 64   ;;  %s4136_s23 = sshll.u32 %s3163_s19, 6 }
 0x645   : > { %s487_s28 = scalar_lea.vmem [#allocation9], %s4136_s23 }
 0x648   : > { %2440 = vrot.lane.b32.xlu1 %v2439_v42, %s4095_s20  ;;  %s2578_s20 = sshll.u32 %s487_s28, 4  ;;  %s3941_s20 = int_to_ptr.vmem [resolvable:$true] %s2578_s20 }
 0x649   : > { %s2883_s29 = scalar_lea.vmem %s3941_s20, 1024 }
 0x64a   : > { %p2884_p6 = scmp.ne.s32.totalorder %s3941_s20, %s2883_s29 }
 0x64c   : > { %2444 = vrot.lane.b32.xlu1 %v2439_v42, %s4096_s15  ;;  %p2885_p12 = pnand %p2884_p6, %p4137_p11 }
 0x64e   : > { %p2886_p13 = pneg %p2885_p12 }
 0x650   : > { %2465 = vperm.xlu1 %2797, %v573_v22  }
 0x653   : > { %v556_v30 = vpop.xlane.xlu1 %555 }
 0x654   : > { %v568_v35 = vadd.f32 %v564_v36, %v556_v30 }
 0x656   : > { %v572_v40 = vmax.f32 %v568_v35, 0.0 }
 0x657   : > { %v3742_v45 = vpop.permute.xlu1 %2455 }
 0x658   : > { %2460 = vperm.xlu0 %2796, %v572_v40  }
 0x65c   : > { %2448 = vrot.lane.b32.xlu0 %v2439_v42, %s4097_s21  ;;  %s2887_s21 = sshll.u32 %s2979_s30, 4  ;;  %s2888_s21 = int_to_ptr.vmem [resolvable:$false] %s2887_s21 }
 0x65d   : > { %s2889_s23 = scalar_lea.vmem %s2888_s21, 2048  ;;  %p2890_p8 = scmp.lt.s32.totalorder %s3941_s20, %s2888_s21 }
 0x65e   : > { %p2891_p10 = scmp.lt.s32.totalorder %s2889_s23, %s2883_s29 }
 0x660   : > { %2470 = vperm.xlu0 %2796, %v574_v28   ;;  %p2892_p0 = por %p2891_p10, %p2890_p8 }
 0x662   : > { %p2893_p2 = pnand %p2892_p0, %p2886_p13 }
 0x6a2   : > { %v2312_v53 = vpop.permute.xlu1 %2311  ;;  %v2304_v54 = vpop.permute.xlu0 %2303 }
 0x6a3   : > { %2310 = vst.msk [vmem:[#allocation4] sm:$0x1] %vm3755_vm2, %v2304_v54 }
 0x6a4   : > { %2317 = vst.msk [vmem:[#allocation4] sm:$0x1] %vm4034_vm10, %v2312_v53 }
 0x6a6   : > { %v2335_v56 = vpop.permute.xlu1 %2334  ;;  %v2359_v57 = vpop.permute.xlu0 %2358 }
 0x6a7   : > { %v2336_v58 = vrot.slane %v2335_v56, 1 }
 0x6a9   : > { %v2338_v26 = vsel %vm2337_vm9, %v2335_v56, %v2336_v58  ;;  %vm4036_vm9 = vmand %vm3813_vm3, %vm3818_vm14 }
 0x6aa   : > { %2343 = vst.msk [vmem:[#allocation4] sm:$0x1] %vm4031_vm6, %v2338_v26  ;;  %v2406_v61 = vpop.permute.xlu1 %2405  ;;  %v2366_v59 = vpop.permute.xlu0 %2365  ;;  %vm3844_vm6 = vcmp.ge.s32.totalorder %v543_v19, 96 }
 0x6ab   : > { %2364 = vst.msk [vmem:[#allocation4] sm:$0x1] %vm4032_vm7, %v2359_v57  ;;  %vm3849_vm7 = vcmp.lt.s32.totalorder %v543_v19, 112 }
 0x6ac   : > { %2408 = vst.msk [vmem:[#allocation4 + $0x1] sm:$0x1] %vm3755_vm2, %v2406_v61  ;;  %vm3854_vm2 = vcmp.ge.s32.totalorder %v543_v19, 112  ;;  %vm2384_vm10 = vmand %vm3844_vm6, %vm3849_vm7 }
 0x6ad   : > { %2371 = vst.msk [vmem:[#allocation4] sm:$0x1] %vm4033_vm5, %v2366_v59  ;;  %vm3859_vm5 = vcmp.lt.s32.totalorder %v543_v19, 128  ;;  %vm4128_vm6 = vmand %vm3745_vm0, %vm3750_vm15 }
 0x6ae   : > { %v2414_v63 = vpop.permute.xlu1 %2413  ;;  %v2373_v0 = vpop.permute.xlu0 %2372  ;;  %v4127_v5 = vsel %vm3859_vm5, 4294967295, %v4126_v5  ;;  %vm4037_vm1 = vmand %vm3854_vm2, %vm3859_vm5 }
 0x6af   : > { %2378 = vst.msk [vmem:[#allocation4] sm:$0x1] %vm4036_vm9, %v2373_v0  ;;  %vm4129_vm7 = vmand %vm3771_vm4, %vm3776_vm8  ;;  %vm4134_vm15 = vnez %v4127_v5 }
 0x6b0   : > { %vm4130_vm9 = vmand %vm3781_vm11, %vm3786_vm12 }
 0x6b1   : > { %vm4133_vm0 = vmand %vm3813_vm3, %vm3818_vm14 }
 0x6b2   : > { %v2418_v19 = vpop.permute.xlu1 %2417  ;;  %v2380_v6 = vpop.permute.xlu0 %2379  ;;  %vm4135_vm4 = vmand %vm3854_vm2, %vm4134_vm15 }
 0x6b3   : > { %2385 = vst.msk [vmem:[#allocation4] sm:$0x1] %vm2384_vm10, %v2380_v6 }
 0x6b4   : > { %2389 = vst.msk [vmem:[#allocation4] sm:$0x1] %vm4037_vm1, %v3714_v21  ;;  %vm4131_vm1 = vnez %v4115_v24 }
 0x6b5   : > { %vm4132_vm5 = vmand %vm3791_vm13, %vm4131_vm1 }
 0x6b6   : > { %v2422_v8 = vpop.permute.xlu1 %2421  ;;  %v2410_v2 = vpop.permute.xlu0 %2409 }
 0x6b7   : > { %2412 = vst.msk [vmem:[#allocation4 + $0x1] sm:$0x1] %vm4128_vm6, %v2410_v2 }
 0x6b8   : > { %2416 = vst.msk [vmem:[#allocation4 + $0x1] sm:$0x1] %vm4129_vm7, %v2414_v63 }
 0x6b9   : > { %2420 = vst.msk [vmem:[#allocation4 + $0x1] sm:$0x1] %vm4130_vm9, %v2418_v19 }
 0x6ba   : > { %v2441_v21 = vpop.permute.xlu1 %2440  ;;  %2424 = vst.msk [vmem:[#allocation4 + $0x1] sm:$0x1] %vm4132_vm5, %v2422_v8 }
 0x6bb   : > { %2443 = vst.msk [vmem:[#allocation4 + $0x1] sm:$0x1] %vm4133_vm0, %v2441_v21 }
 0x6be   : > { %v2445_v44 = vpop.permute.xlu1 %2444 }
 0x6bf   : > { %2447 = vst.msk [vmem:[#allocation4 + $0x1] sm:$0x1] %vm2384_vm10, %v2445_v44 }
 0x6cf   : > { %v2466_v13 = vpop.permute.xlu1 %2465 }
 0x6d7   : > { %v2461_v9 = vpop.permute.xlu0 %2460 }
 0x6db   : > { %v2449_v10 = vpop.permute.xlu0 %2448 }
 0x6dc   : > { %2451 = vst.msk [vmem:[#allocation4 + $0x1] sm:$0x1] %vm4135_vm4, %v2449_v10 }
 0x6df   : > { %v2471_v22 = vpop.permute.xlu0 %2470 }
 0x6e3   : > { %v2452_v16 = vld [vmem:[#allocation4] sm:$0x3] }
 0x6e4   : > { %v2477_v11 = vrot.slane %v2452_v16, %v3422_v34  ;;  %v2481_v12 = vrot.slane %v2452_v16, %v1416_v37 }
 0x6e6   : > { %v2484_v48 = vadd.f32 %v2477_v11, %v3742_v45  ;;  %v2485_v14 = vadd.f32 %v2481_v12, %v3742_v45  ;;  %v2486_v42 = vadd.f32 %v2477_v11, %v2461_v9  ;;  %v2487_v15 = vadd.f32 %v2481_v12, %v2461_v9 }
 0x6e7   : > { %v2488_v32 = vadd.f32 %v2477_v11, %v2466_v13  ;;  %v2489_v33 = vadd.f32 %v2481_v12, %v2466_v13  ;;  %v2490_v40 = vadd.f32 %v2477_v11, %v2471_v22  ;;  %v2491_v1 = vadd.f32 %v2481_v12, %v2471_v22 }
 0x6e8   : > { %v2685_v36 = vmul.f32 -1.442695, %v2484_v48  ;;  %v2686_v30 = vmul.f32 -1.442695, %v2485_v14  ;;  %v2687_v35 = vmul.f32 -1.442695, %v2486_v42 }
 0x6e9   : > { %v2688_v43 = vmul.f32 -1.442695, %v2487_v15  ;;  %v2689_v34 = vmul.f32 -1.442695, %v2488_v32  ;;  %v2690_v20 = vmul.f32 -1.442695, %v2489_v33 }
 0x6ea   : > { %2813 = vpow2.f32 %v2685_v36  ;;  %v2691_v37 = vmul.f32 -1.442695, %v2490_v40  ;;  %v2692_v23 = vmul.f32 -1.442695, %v2491_v1 }
 0x6eb   : > { %2815 = vpow2.f32 %v2686_v30 }
 0x6ec   : > { %2817 = vpow2.f32 %v2687_v35 }
 0x6ed   : > { %2819 = vpow2.f32 %v2688_v43 }
 0x6ee   : > { %2821 = vpow2.f32 %v2689_v34 }
 0x6ef   : > { %2823 = vpow2.f32 %v2690_v20 }
 0x6f0   : > { %2825 = vpow2.f32 %v2691_v37 }
 0x6f1   : > { %2827 = vpow2.f32 %v2692_v23 }
 0x6f4   : > { %v2814_v28 = vpop.eup %2813 }
 0x6f5   : > { %v2816_v45 = vpop.eup %2815  ;;  %v2516_v49 = vadd.f32 1.0, %v2814_v28 }
 0x6f6   : > { %v2818_v50 = vpop.eup %2817  ;;  %v2517_v51 = vadd.f32 1.0, %v2816_v45 }
 0x6f7   : > { %v2820_v53 = vpop.eup %2819  ;;  %v2518_v54 = vadd.f32 1.0, %v2818_v50  ;;  %2829 = vrcp.f32 %v2516_v49 }
 0x6f8   : > { %v2822_v46 = vpop.eup %2821  ;;  %v2519_v47 = vadd.f32 1.0, %v2820_v53  ;;  %2831 = vrcp.f32 %v2517_v51 }
 0x6f9   : > { %v2824_v52 = vpop.eup %2823  ;;  %v2520_v55 = vadd.f32 1.0, %v2822_v46  ;;  %2833 = vrcp.f32 %v2518_v54 }
 0x6fa   : > { %v2826_v56 = vpop.eup %2825  ;;  %v2521_v57 = vadd.f32 1.0, %v2824_v52  ;;  %2835 = vrcp.f32 %v2519_v47 }
 0x6fb   : > { %v2828_v4 = vpop.eup %2827  ;;  %2837 = vrcp.f32 %v2520_v55  ;;  %v2522_v24 = vadd.f32 1.0, %v2826_v56 }
 0x6fc   : > { %2839 = vrcp.f32 %v2521_v57  ;;  %v2523_v58 = vadd.f32 1.0, %v2828_v4 }
 0x6fd   : > { %2841 = vrcp.f32 %v2522_v24 }
 0x6fe   : > { %2843 = vrcp.f32 %v2523_v58 }
 0x701   : > { %v2830_v26 = vpop.eup %2829 }
 0x702   : > { %v2832_v27 = vpop.eup %2831  ;;  %v2540_v60 = vmul.f32 %v3534_v18, %v2830_v26 }
 0x703   : > { %v2834_v61 = vpop.eup %2833  ;;  %v2541_v59 = vmul.f32 %v3531_v17, %v2832_v27 }
 0x704   : > { %v2836_v7 = vpop.eup %2835  ;;  %v2542_v62 = vmul.f32 %v3554_v31, %v2834_v61  ;;  %v2548_v63 = vadd.f32 %v3534_v18, %v2540_v60 }
 0x705   : > { %v2838_v0 = vpop.eup %2837  ;;  %v2543_v3 = vmul.f32 %v3551_v29, %v2836_v7  ;;  %v2549_v5 = vadd.f32 %v3531_v17, %v2541_v59 }
 0x706   : > { %v2840_v19 = vpop.eup %2839  ;;  %v2544_v6 = vmul.f32 %v3546_v25, %v2838_v0  ;;  %v2550_v8 = vadd.f32 %v3554_v31, %v2542_v62  ;;  %2556 = vst [vmem:[%s487_s28] sm:$0xff] %v2548_v63 }
 0x707   : > { %v2842_v2 = vpop.eup %2841  ;;  %v2545_v21 = vmul.f32 %v3543_v41, %v2840_v19  ;;  %v2551_v44 = vadd.f32 %v3551_v29, %v2543_v3  ;;  %2557 = vst [vmem:[%s487_s28 + $0x8] sm:$0xff] %v2549_v5 }
 0x708   : > { %v2844_v18 = vpop.eup %2843  ;;  %v2552_v9 = vadd.f32 %v3546_v25, %v2544_v6  ;;  %2558 = vst [vmem:[%s487_s28 + $0x10] sm:$0xff] %v2550_v8  ;;  %v2546_v17 = vmul.f32 %v3563_v39, %v2842_v2 }
 0x709   : > { %v2553_v31 = vadd.f32 %v3543_v41, %v2545_v21  ;;  %2559 = vst [vmem:[%s487_s28 + $0x18] sm:$0xff] %v2551_v44  ;;  %v2547_v10 = vmul.f32 %v3560_v38, %v2844_v18 }
 0x70a   : > { %2560 = vst [vmem:[%s487_s28 + $0x20] sm:$0xff] %v2552_v9  ;;  %v2554_v16 = vadd.f32 %v3563_v39, %v2546_v17 }
 0x70b   : > { %2561 = vst [vmem:[%s487_s28 + $0x28] sm:$0xff] %v2553_v31  ;;  %v2555_v25 = vadd.f32 %v3560_v38, %v2547_v10 }
 0x70c   : > { %2562 = vst [vmem:[%s487_s28 + $0x30] sm:$0xff] %v2554_v16 }
 0x70d   : > { %2563 = vst [vmem:[%s487_s28 + $0x38] sm:$0xff] %v2555_v25 }
 0x70e   : > { %2896 = shalt.err (!%p2893_p2)
}
 0x70f   : > { %s2897_s28 = scalar_lea.hbm %s3938_s13, 1024  ;;  %s2901_s25 = scalar_lea.hbm %s4000_s14, 2048 }
 0x710   : > { %p2898_p4 = scmp.ne.s32.totalorder %s3938_s13, %s2897_s28  ;;  %p2902_p9 = scmp.lt.u32.totalorder %s3938_s13, %s4000_s14 }
 0x711   : > { %p2903_p1 = scmp.lt.u32.totalorder %s2901_s25, %s2897_s28  ;;  %p2905_p6 = scmp.lt.u32.totalorder %s2897_s28, %s3938_s13 }
 0x712   : > { %p2899_p5 = pnand %p2898_p4, %p4137_p11 }
 0x713   : > { %p2904_p3 = por %p2903_p1, %p2902_p9 }
 0x714   : > { %p2900_p7 = pneg %p2899_p5 }
 0x715   : > { %p2906_p12 = por %p2905_p6, %p2904_p3 }
 0x717   : > { %p2907_p13 = pnand %p2906_p12, %p2900_p7 }
 0x719   : > { %2910 = shalt.err (!%p2907_p13)
}
 0x71a   : > { %s2980_s29 = smov 256  }
 0x71b   : > { %2724 = dma.vmem_to_hbm [thread:$0]  (%p4137_p11), %s3941_s20, 1024, %s3938_s13, %s2565_s22, %s2980_s29, %s2980_s29, %s4089_s24  }
 0x71c PF: > { %s4138_s23 = sld [smem:[#allocation12_spill]]  ;;  %p4139_p8 = scmp.ne.s32.totalorder %s4046_s27, 0 }
 0x71d   : > { %p4140_p10 = scmp.ge.s32.totalorder %s2949_s18, 2 }
 0x71f   : > { %p2731_p0 = pnand %p4140_p10, %p4139_p8 }
 0x722   : > { %s2593_s17 = sand.u32 1, %s4138_s23  }
 0x723   : > { %s2594_s28 = scalar_lea.sflag [#allocation8], %s2593_s17 }
 0x724   : > { %2932 = dma.done.wait (!%p2731_p0), %s2594_s28, 1024  }
 0x725   : > { %2934 = vsyncadd (!%p2731_p0), %s2594_s28, 4294966272  ;;  %s4141_s18 = sld [smem:[#allocation14_spill]]  ;;  %s4142_s26 = sld [smem:[#allocation13_spill]] }
 0x726   : > { %s4143_s17 = sld [smem:[#allocation15_spill]]  ;;  %s4144_s15 = smov %s2941_s16 }
 0x72b   : > { %p29_p2 = scmp.ge.s32.totalorder %s4141_s18, 4   ;;  %s4145_s16 = smov %s4142_s26 }
 0x72d   :  { %31 = sbr.rel (!%p29_p2) target bundleno = 8 (0x8), region = 121 }
 0x734   :  { %2599 = vsyncpa [#allocation7], 1 }
 0x735   :  { %2601 = vsyncpa [#allocation7 + $0x1], 1 }
 0x736   :  { %2602 = vsyncpa [#allocation8], 1 }
 0x737   :  { %2604 = vsyncpa [#allocation8 + $0x1], 1 }

</bundles_post_ra>
